<compile_context>
chip_gen: v6e
topology: v6e:2x2x1
jax: 0.10.0
libtpu: 0.0.40
codegen_flags: <defaults>
</compile_context>

<pallas_src>
import jax
import jax.numpy as jnp
from jax.experimental import pallas as pl
from jax.experimental.pallas import tpu as pltpu

ART_POINT_COUNTS = 20
HIDDEN = (128, 256, 256, 1)
MAX_TILE_BATCH = 2048   # rows per grid step (cap); always a multiple of 256.
MIN_TILE_BATCH = 256


def _choose_tile(batch, max_tile=MAX_TILE_BATCH, min_tile=MIN_TILE_BATCH):
    """Pick the batch tile: as large as possible (to amortize per-step
    overhead) but such that num_tiles >= 2 when the batch allows it, so the
    'parallel' grid axis can span both TensorCores on v7x megacore parts."""
    b = ((max(batch, min_tile) + min_tile - 1) // min_tile) * min_tile
    if b <= min_tile:
        return min_tile
    half = ((b // 2 + min_tile - 1) // min_tile) * min_tile
    return min(max_tile, half)


def _disc_kernel(x_ref,
                 w1_ref, b1_ref,
                 w2_ref, b2_ref,
                 w3_ref, b3_ref,
                 w4_ref, b4_ref,
                 o_ref):
    # Feature-major layout: activations are (features, TB).  Every layer is a
    # straight MXU matmul (bf16 operands, f32 accumulation); bias-add / ReLU
    # on the VPU; sigmoid on the EUP.  No transposes anywhere in the kernel.
    x = x_ref[...].astype(jnp.bfloat16)                                    # (20, TB)
    # Layer 1: Linear(20, 128) + ReLU
    h = jnp.dot(w1_ref[...], x, preferred_element_type=jnp.float32)       # (128, TB)
    h = jnp.maximum(h + b1_ref[...], 0.0).astype(jnp.bfloat16)
    # Layer 2: Linear(128, 256) + ReLU
    h = jnp.dot(w2_ref[...], h, preferred_element_type=jnp.float32)       # (256, TB)
    h = jnp.maximum(h + b2_ref[...], 0.0).astype(jnp.bfloat16)
    # Layer 3: Linear(256, 256) + ReLU
    h = jnp.dot(w3_ref[...], h, preferred_element_type=jnp.float32)       # (256, TB)
    h = jnp.maximum(h + b3_ref[...], 0.0).astype(jnp.bfloat16)
    # Layer 4: Linear(256, 1) + Sigmoid -> lane-dense (1, TB) row.
    logits = jnp.dot(w4_ref[...], h, preferred_element_type=jnp.float32)  # (1, TB)
    logits = logits + b4_ref[0]                                           # scalar bias (SMEM)
    o_ref[...] = jax.nn.sigmoid(logits).astype(o_ref.dtype)


@jax.jit
def discriminator_forward(x, params):
    """x: (B, 20) f32; params: list of (W, b) in PyTorch layout: W (out, in), b (out,)."""
    (w1, b1), (w2, b2), (w3, b3), (w4, b4) = params
    batch, feat = x.shape
    tb = _choose_tile(batch)
    num_tiles = pl.cdiv(batch, tb)
    b_pad = num_tiles * tb

    # Feature-major input (20, b_pad); bf16 cast happens in-kernel.
    x_t = jnp.transpose(x)
    if b_pad != batch:
        x_t = jnp.pad(x_t, ((0, 0), (0, b_pad - batch)))

    # bf16 matmul operands (f32 accumulation in-kernel); biases stay f32.
    w1b = w1.astype(jnp.bfloat16)        # (128, 20)
    w2b = w2.astype(jnp.bfloat16)        # (256, 128)
    w3b = w3.astype(jnp.bfloat16)        # (256, 256)
    w4b = w4.astype(jnp.bfloat16)        # (1, 256)
    b1c = b1.reshape(-1, 1)              # (128, 1)
    b2c = b2.reshape(-1, 1)              # (256, 1)
    b3c = b3.reshape(-1, 1)              # (256, 1)
    b4s = b4.reshape(-1)                 # (1,)  -> SMEM scalar

    def resident(a):
        # Full-array block with constant index_map: DMA'd once, stays resident
        # in VMEM across all grid steps (weights total ~0.2 MiB in bf16).
        return pl.BlockSpec(a.shape, lambda i: (0,) * a.ndim)

    flops = 2 * b_pad * (feat * 128 + 128 * 256 + 256 * 256 + 256 * 1)
    bytes_accessed = (int(x_t.size) * 4 + b_pad * 4
                      + sum(int(w.size) * 2 for w in (w1b, w2b, w3b, w4b))
                      + (128 + 256 + 256 + 1) * 4)

    out = pl.pallas_call(
        _disc_kernel,
        out_shape=jax.ShapeDtypeStruct((1, b_pad), jnp.float32),
        grid=(num_tiles,),
        in_specs=[
            pl.BlockSpec((feat, tb), lambda i: (0, i)),          # x: tiled over batch
            resident(w1b), resident(b1c),
            resident(w2b), resident(b2c),
            resident(w3b), resident(b3c),
            resident(w4b),
            pl.BlockSpec(memory_space=pltpu.MemorySpace.SMEM),   # scalar final bias
        ],
        # Lane-dense output: one (1, tb) row per grid step (unmasked stores).
        out_specs=pl.BlockSpec((1, tb), lambda i: (0, i)),
        compiler_params=pltpu.CompilerParams(
            dimension_semantics=("parallel",),
            vmem_limit_bytes=32 * 1024 * 1024,
        ),
        cost_estimate=pl.CostEstimate(
            flops=flops,
            transcendentals=b_pad,
            bytes_accessed=bytes_accessed,
        ),
    )(x_t, w1b, b1c, w2b, b2c, w3b, b3c, w4b, b4s)

    return out.reshape(b_pad, 1)[:batch]


def init_params(key):
    """Deterministic init mimicking PyTorch nn.Linear default:
    U(-1/sqrt(fan_in), 1/sqrt(fan_in)).  Weights kept in PyTorch (out, in)
    layout; biases are (out,)."""
    dims = (ART_POINT_COUNTS,) + HIDDEN
    params = []
    for i in range(len(dims) - 1):
        fan_in, fan_out = dims[i], dims[i + 1]
        key, kw, kb = jax.random.split(key, 3)
        bound = float(fan_in) ** -0.5
        w = jax.random.uniform(kw, (fan_out, fan_in), jnp.float32, -bound, bound)
        b = jax.random.uniform(kb, (fan_out,), jnp.float32, -bound, bound)
        params.append((w, b))
    return params


def reference_forward(x, params):
    """Pure-JAX reference using the same bf16-operand / f32-accumulate recipe."""
    (w1, b1), (w2, b2), (w3, b3), (w4, b4) = params
    bf = jnp.bfloat16
    h = jnp.dot(x.astype(bf), w1.T.astype(bf), preferred_element_type=jnp.float32)
    h = jnp.maximum(h + b1, 0.0)
    h = jnp.dot(h.astype(bf), w2.T.astype(bf), preferred_element_type=jnp.float32)
    h = jnp.maximum(h + b2, 0.0)
    h = jnp.dot(h.astype(bf), w3.T.astype(bf), preferred_element_type=jnp.float32)
    h = jnp.maximum(h + b3, 0.0)
    logits = jnp.dot(h.astype(bf), w4.T.astype(bf),
                     preferred_element_type=jnp.float32) + b4
    return jax.nn.sigmoid(logits)


if __name__ == "__main__":
    key = jax.random.PRNGKey(0)
    key, kx1, kx2 = jax.random.split(key, 3)
    params = init_params(key)

    # Small primary test + a multi-tile test that exercises padding and the
    # num_tiles >= 2 path.
    for batch, kx in ((8, kx1), (600, kx2)):
        x = jax.random.normal(kx, (batch, ART_POINT_COUNTS), jnp.float32)
        out = jax.block_until_ready(discriminator_forward(x, params))
        ref = reference_forward(x, params)
        assert out.shape == (batch, 1), out.shape
        max_err = float(jnp.max(jnp.abs(out - ref)))
        assert max_err < 2e-3, f"batch={batch}: max abs err {max_err}"

    print("KERNEL_OK")
</pallas_src>

<mosaic_0001>
module attributes {stable_mosaic.version = 11 : i64} {
  func.func @_disc_kernel(%arg0: i32, %arg1: memref<20x256xf32, #tpu.memory_space<vmem>>, %arg2: memref<128x20xbf16, #tpu.memory_space<vmem>>, %arg3: memref<128x1xf32, #tpu.memory_space<vmem>>, %arg4: memref<256x128xbf16, #tpu.memory_space<vmem>>, %arg5: memref<256x1xf32, #tpu.memory_space<vmem>>, %arg6: memref<256x256xbf16, #tpu.memory_space<vmem>>, %arg7: memref<256x1xf32, #tpu.memory_space<vmem>>, %arg8: memref<1x256xbf16, #tpu.memory_space<vmem>>, %arg9: memref<1xf32, #tpu.memory_space<smem>>, %arg10: memref<1x256xf32, #tpu.memory_space<vmem>>) attributes {dimension_semantics = [#tpu.dimension_semantics<parallel>], iteration_bounds = array<i64: 1>, scalar_prefetch = 0 : i64, scratch_operands = 0 : i64, tpu.core_type = #tpu.core_type<tc>, window_params = [{transform_indices = @transform_0, window_bounds = array<i64: 20, 256>}, {pipeline_mode = #tpu.pipeline_mode<synchronous>, transform_indices = @transform_1, window_bounds = array<i64: 128, 20>}, {pipeline_mode = #tpu.pipeline_mode<synchronous>, transform_indices = @transform_2, window_bounds = array<i64: 128, 1>}, {pipeline_mode = #tpu.pipeline_mode<synchronous>, transform_indices = @transform_3, window_bounds = array<i64: 256, 128>}, {pipeline_mode = #tpu.pipeline_mode<synchronous>, transform_indices = @transform_4, window_bounds = array<i64: 256, 1>}, {pipeline_mode = #tpu.pipeline_mode<synchronous>, transform_indices = @transform_5, window_bounds = array<i64: 256, 256>}, {pipeline_mode = #tpu.pipeline_mode<synchronous>, transform_indices = @transform_6, window_bounds = array<i64: 256, 1>}, {pipeline_mode = #tpu.pipeline_mode<synchronous>, transform_indices = @transform_7, window_bounds = array<i64: 1, 256>}, {transform_indices = @transform_8, window_bounds = array<i64: 1>}, {transform_indices = @transform_9, window_bounds = array<i64: 1, 256>}]} {
    %c0 = arith.constant 0 : index
    %c0_0 = arith.constant 0 : index
    %0 = vector.load %arg1[%c0, %c0_0] : memref<20x256xf32, #tpu.memory_space<vmem>>, vector<20x256xf32>
    %1 = arith.truncf %0 : vector<20x256xf32> to vector<20x256xbf16>
    %c0_1 = arith.constant 0 : index
    %c0_2 = arith.constant 0 : index
    %2 = vector.load %arg2[%c0_1, %c0_2] : memref<128x20xbf16, #tpu.memory_space<vmem>>, vector<128x20xbf16>
    %cst = arith.constant dense<0.000000e+00> : vector<128x256xf32>
    %3 = tpu.matmul %2, %1, %cst {dimension_numbers = #tpu.dot_dimension_numbers<[1], [0], [0], [1], [0, 0, 1, 1], [], []>} : vector<128x20xbf16>, vector<20x256xbf16>, vector<128x256xf32> -> vector<128x256xf32>
    %c0_3 = arith.constant 0 : index
    %c0_4 = arith.constant 0 : index
    %4 = vector.load %arg3[%c0_3, %c0_4] : memref<128x1xf32, #tpu.memory_space<vmem>>, vector<128x1xf32>
    %5 = vector.broadcast %4 : vector<128x1xf32> to vector<128x256xf32>
    %6 = arith.addf %3, %5 : vector<128x256xf32>
    %cst_5 = arith.constant 0.000000e+00 : f32
    %7 = vector.broadcast %cst_5 : f32 to vector<128x256xf32>
    %8 = arith.maximumf %6, %7 : vector<128x256xf32>
    %9 = arith.truncf %8 : vector<128x256xf32> to vector<128x256xbf16>
    %c0_6 = arith.constant 0 : index
    %c0_7 = arith.constant 0 : index
    %10 = vector.load %arg4[%c0_6, %c0_7] : memref<256x128xbf16, #tpu.memory_space<vmem>>, vector<256x128xbf16>
    %cst_8 = arith.constant dense<0.000000e+00> : vector<256x256xf32>
    %11 = tpu.matmul %10, %9, %cst_8 {dimension_numbers = #tpu.dot_dimension_numbers<[1], [0], [0], [1], [0, 0, 1, 1], [], []>} : vector<256x128xbf16>, vector<128x256xbf16>, vector<256x256xf32> -> vector<256x256xf32>
    %c0_9 = arith.constant 0 : index
    %c0_10 = arith.constant 0 : index
    %12 = vector.load %arg5[%c0_9, %c0_10] : memref<256x1xf32, #tpu.memory_space<vmem>>, vector<256x1xf32>
    %13 = vector.broadcast %12 : vector<256x1xf32> to vector<256x256xf32>
    %14 = arith.addf %11, %13 : vector<256x256xf32>
    %cst_11 = arith.constant 0.000000e+00 : f32
    %15 = vector.broadcast %cst_11 : f32 to vector<256x256xf32>
    %16 = arith.maximumf %14, %15 : vector<256x256xf32>
    %17 = arith.truncf %16 : vector<256x256xf32> to vector<256x256xbf16>
    %c0_12 = arith.constant 0 : index
    %c0_13 = arith.constant 0 : index
    %18 = vector.load %arg6[%c0_12, %c0_13] : memref<256x256xbf16, #tpu.memory_space<vmem>>, vector<256x256xbf16>
    %cst_14 = arith.constant dense<0.000000e+00> : vector<256x256xf32>
    %19 = tpu.matmul %18, %17, %cst_14 {dimension_numbers = #tpu.dot_dimension_numbers<[1], [0], [0], [1], [0, 0, 1, 1], [], []>} : vector<256x256xbf16>, vector<256x256xbf16>, vector<256x256xf32> -> vector<256x256xf32>
    %c0_15 = arith.constant 0 : index
    %c0_16 = arith.constant 0 : index
    %20 = vector.load %arg7[%c0_15, %c0_16] : memref<256x1xf32, #tpu.memory_space<vmem>>, vector<256x1xf32>
    %21 = vector.broadcast %20 : vector<256x1xf32> to vector<256x256xf32>
    %22 = arith.addf %19, %21 : vector<256x256xf32>
    %cst_17 = arith.constant 0.000000e+00 : f32
    %23 = vector.broadcast %cst_17 : f32 to vector<256x256xf32>
    %24 = arith.maximumf %22, %23 : vector<256x256xf32>
    %25 = arith.truncf %24 : vector<256x256xf32> to vector<256x256xbf16>
    %c0_18 = arith.constant 0 : index
    %c0_19 = arith.constant 0 : index
    %26 = vector.load %arg8[%c0_18, %c0_19] : memref<1x256xbf16, #tpu.memory_space<vmem>>, vector<1x256xbf16>
    %cst_20 = arith.constant dense<0.000000e+00> : vector<1x256xf32>
    %27 = tpu.matmul %26, %25, %cst_20 {dimension_numbers = #tpu.dot_dimension_numbers<[1], [0], [0], [1], [0, 0, 1, 1], [], []>} : vector<1x256xbf16>, vector<256x256xbf16>, vector<1x256xf32> -> vector<1x256xf32>
    %c0_21 = arith.constant 0 : index
    %28 = memref.load %arg9[%c0_21] : memref<1xf32, #tpu.memory_space<smem>>
    %29 = vector.broadcast %28 : f32 to vector<1x256xf32>
    %30 = arith.addf %27, %29 : vector<1x256xf32>
    %31 = arith.negf %30 : vector<1x256xf32>
    %32 = math.exp %31 : vector<1x256xf32>
    %cst_22 = arith.constant 1.000000e+00 : f32
    %33 = vector.broadcast %cst_22 : f32 to vector<1x256xf32>
    %34 = arith.addf %33, %32 : vector<1x256xf32>
    %35 = arith.divf %33, %34 : vector<1x256xf32>
    %c0_23 = arith.constant 0 : index
    %c0_24 = arith.constant 0 : index
    %36 = vector.load %arg10[%c0_23, %c0_24] : memref<1x256xf32, #tpu.memory_space<vmem>>, vector<1x256xf32>
    tpu.vector_store %arg10[%c0_23, %c0_24], %35 {strides = array<i32>} : memref<1x256xf32, #tpu.memory_space<vmem>>, vector<1x256xf32>,
    return
  }
  func.func @transform_0(%arg0: i32) -> (i32, i32) {
    %c0_i32 = arith.constant 0 : i32
    %c0_i32_0 = arith.constant 0 : i32
    return %c0_i32, %arg0 : i32, i32
  }
  func.func @transform_1(%arg0: i32) -> (i32, i32) {
    %c0_i32 = arith.constant 0 : i32
    %c0_i32_0 = arith.constant 0 : i32
    %c0_i32_1 = arith.constant 0 : i32
    return %c0_i32, %c0_i32_0 : i32, i32
  }
  func.func @transform_2(%arg0: i32) -> (i32, i32) {
    %c0_i32 = arith.constant 0 : i32
    %c0_i32_0 = arith.constant 0 : i32
    %c0_i32_1 = arith.constant 0 : i32
    return %c0_i32, %c0_i32_0 : i32, i32
  }
  func.func @transform_3(%arg0: i32) -> (i32, i32) {
    %c0_i32 = arith.constant 0 : i32
    %c0_i32_0 = arith.constant 0 : i32
    %c0_i32_1 = arith.constant 0 : i32
    return %c0_i32, %c0_i32_0 : i32, i32
  }
  func.func @transform_4(%arg0: i32) -> (i32, i32) {
    %c0_i32 = arith.constant 0 : i32
    %c0_i32_0 = arith.constant 0 : i32
    %c0_i32_1 = arith.constant 0 : i32
    return %c0_i32, %c0_i32_0 : i32, i32
  }
  func.func @transform_5(%arg0: i32) -> (i32, i32) {
    %c0_i32 = arith.constant 0 : i32
    %c0_i32_0 = arith.constant 0 : i32
    %c0_i32_1 = arith.constant 0 : i32
    return %c0_i32, %c0_i32_0 : i32, i32
  }
  func.func @transform_6(%arg0: i32) -> (i32, i32) {
    %c0_i32 = arith.constant 0 : i32
    %c0_i32_0 = arith.constant 0 : i32
    %c0_i32_1 = arith.constant 0 : i32
    return %c0_i32, %c0_i32_0 : i32, i32
  }
  func.func @transform_7(%arg0: i32) -> (i32, i32) {
    %c0_i32 = arith.constant 0 : i32
    %c0_i32_0 = arith.constant 0 : i32
    %c0_i32_1 = arith.constant 0 : i32
    return %c0_i32, %c0_i32_0 : i32, i32
  }
  func.func @transform_8(%arg0: i32) -> i32 {
    %c0_i32 = arith.constant 0 : i32
    %c0_i32_0 = arith.constant 0 : i32
    return %c0_i32 : i32
  }
  func.func @transform_9(%arg0: i32) -> (i32, i32) {
    %c0_i32 = arith.constant 0 : i32
    %c0_i32_0 = arith.constant 0 : i32
    return %c0_i32, %arg0 : i32, i32
  }
}

</mosaic_0001>

<bundles_post_ra>
// kernel: discriminator_forward.1
= control target key start
LH: loop header
LB: loop body
LE: loop exit
PB: predicated region body
PF: predicated region fallthrough
CT: control target
= control target key end

     0   :  { %v1931_v0 = vmov 0   ;;  %vm221_vm0 = vcmask 1041408   ;;  %vm196_vm1 = vcmask 162816   ;;  %s2900_s2 = inlined_call_operand.vmem [shape: f32[128,1], index: 2, kind: input, shape index: {}]   ;;  %s2901_s0 = inlined_call_operand.vmem [shape: f32[20,256], index: 0, kind: input, shape index: {}]   ;;  %s2902_s1 = inlined_call_operand.vmem [shape: bf16[128,20], index: 1, kind: input, shape index: {}]   ;;  %s2903_s4 = inlined_call_operand.vmem [shape: f32[256,1], index: 4, kind: input, shape index: {}]   ;;  %s2904_s6 = inlined_call_operand.vmem [shape: f32[256,1], index: 6, kind: input, shape index: {}]   ;;  %s2905_s3 = inlined_call_operand.vmem [shape: bf16[256,128], index: 3, kind: input, shape index: {}]   ;;  %s2906_s5 = inlined_call_operand.vmem [shape: bf16[256,256], index: 5, kind: input, shape index: {}]   ;;  %s2907_s7 = inlined_call_operand.vmem [shape: bf16[1,256], index: 7, kind: input, shape index: {}]   ;;  %s2908_s8 = inlined_call_operand.<no memory space> [shape: f32[1], index: 8, kind: input, shape index: {}]   ;;  %s2909_s9 = inlined_call_operand.vmem [shape: f32[1,256], index: 9, kind: output, shape index: {}]  }
   0x1   :  { %1850 = vset.pattern.permute.xlu1 %v1931_v0  ;;  %1849 = vset.pattern.permute.xlu0 %v1931_v0  ;;  %v74_v1 = vld [vmem:[%s2900_s2 + $0x70] sm:$0xff]  ;;  %v72_v2 = vld [vmem:[%s2900_s2 + $0x60] sm:$0xff]  ;;  %v39_v3 = vld [vmem:[%s2901_s0 + $0x28] sm:$0xf] }
   0x2   :  { %148 = vperm.xlu0 %1849, %v74_v1   ;;  %138 = vperm.xlu1 %1850, %v72_v2   ;;  %v43_v4 = vpack.c.bf16 %v39_v3, %v39_v3  ;;  %v38_v5 = vld [vmem:[%s2901_s0 + $0x20] sm:$0xf]  ;;  %v75_v6 = vld [vmem:[%s2900_s2 + $0x78] sm:$0xff]  ;;  %v35_v8 = vld [vmem:[%s2901_s0 + $0x8] sm:$0xff] }
   0x3   :  { %v42_v7 = vpack.c.bf16 %v38_v5, %v38_v5  ;;  %v37_v9 = vld [vmem:[%s2901_s0 + $0x18] sm:$0xff]  ;;  %v34_v10 = vld [vmem:[%s2901_s0] sm:$0xff]  ;;  %260 = vmatprep.mubr.bf16.mxu0 %v1931_v0  ;;  %741 = vmatprep.mubr.bf16.mxu1 %v1931_v0  ;;  %v73_v11 = vld [vmem:[%s2900_s2 + $0x68] sm:$0xff] }
   0x4   :  { %1787 = vmatprep.subr.msk.bf16.mxu0 %vm221_vm0, %v43_v4  ;;  %v41_v12 = vpack.c.bf16 %v37_v9, %v35_v8  ;;  %v36_v13 = vld [vmem:[%s2901_s0 + $0x10] sm:$0xff]  ;;  %v71_v17 = vld [vmem:[%s2900_s2 + $0x58] sm:$0xff]  ;;  %v1851_v18 = vld [vmem:[%s2902_s1] sm:$0xff]  }
   0x5   :  { %v223_v14 = vsel %vm221_vm0, %v42_v7, 0  ;;  %v40_v15 = vpack.c.bf16 %v36_v13, %v34_v10  ;;  %v70_v16 = vld [vmem:[%s2900_s2 + $0x50] sm:$0xff]  ;;  %v68_v19 = vld [vmem:[%s2900_s2 + $0x40] sm:$0xff]  ;;  %v69_v20 = vld [vmem:[%s2900_s2 + $0x48] sm:$0xff] }
   0x6   :  { %241 = vmatpush1.bf16.msra.mxu0 %v223_v14  ;;  %153 = vperm.xlu0 %1849, %v75_v6   ;;  %v66_v21 = vld [vmem:[%s2900_s2 + $0x30] sm:$0xff]  ;;  %v67_v22 = vld [vmem:[%s2900_s2 + $0x38] sm:$0xff]  ;;  %v1852_v23 = vld [vmem:[%s2902_s1 + $0x8] sm:$0xff]  }
   0x7   :  { %143 = vperm.xlu1 %1850, %v73_v11   ;;  %242 = vmatprep.subr.bf16.mxu0 %v41_v12  ;;  %v64_v24 = vld [vmem:[%s2900_s2 + $0x20] sm:$0xff]  ;;  %v65_v25 = vld [vmem:[%s2900_s2 + $0x28] sm:$0xff]  ;;  %v62_v26 = vld [vmem:[%s2900_s2 + $0x10] sm:$0xff] }
   0x8   :  { %v63_v27 = vld [vmem:[%s2900_s2 + $0x18] sm:$0xff]  ;;  %v1853_v28 = vld [vmem:[%s2902_s1 + $0x10] sm:$0xff]   ;;  %v60_v29 = vld [vmem:[%s2900_s2] sm:$0xff] }
   0x9   :  { %v61_v30 = vld [vmem:[%s2900_s2 + $0x8] sm:$0xff]  ;;  %v435_v31 = vld [vmem:[%s2903_s4 + $0x70] sm:$0xff]  ;;  %v436_v32 = vld [vmem:[%s2903_s4 + $0x78] sm:$0xff] }
   0xa   :  { %243 = vmatpush1.bf16.msra.mxu0 %v40_v15  ;;  %128 = vperm.xlu0 %1849, %v70_v16   ;;  %v1854_v33 = vld [vmem:[%s2902_s1 + $0x18] sm:$0xff]   ;;  %v433_v34 = vld [vmem:[%s2903_s4 + $0x60] sm:$0xff]  ;;  %v434_v35 = vld [vmem:[%s2903_s4 + $0x68] sm:$0xff] }
   0xb   :  { %133 = vperm.xlu1 %1850, %v71_v17   ;;  %v431_v36 = vld [vmem:[%s2903_s4 + $0x50] sm:$0xff]  ;;  %v432_v37 = vld [vmem:[%s2903_s4 + $0x58] sm:$0xff]  ;;  %v1855_v38 = vld [vmem:[%s2902_s1 + $0x20] sm:$0xff]  }
   0xc   :  { %v429_v39 = vld [vmem:[%s2903_s4 + $0x40] sm:$0xff]  ;;  %v430_v40 = vld [vmem:[%s2903_s4 + $0x48] sm:$0xff]  ;;  %v427_v41 = vld [vmem:[%s2903_s4 + $0x30] sm:$0xff] }
   0xd   :  { %1788 = vmatmul.mubr.msk.bf16.vlgmr.msra.gmra.mxu0 %vm196_vm1, %v1851_v18  ;;  %v428_v42 = vld [vmem:[%s2903_s4 + $0x38] sm:$0xff]  ;;  %v1856_v43 = vld [vmem:[%s2902_s1 + $0x28] sm:$0xff]   ;;  %v425_v44 = vld [vmem:[%s2903_s4 + $0x20] sm:$0xff] }
   0xe   :  { %118 = vperm.xlu0 %1849, %v68_v19   ;;  %270 = vmatprep.mubr.bf16.mxu0 %v1931_v0  ;;  %v426_v45 = vld [vmem:[%s2903_s4 + $0x28] sm:$0xff]  ;;  %v423_v46 = vld [vmem:[%s2903_s4 + $0x10] sm:$0xff]  ;;  %v424_v47 = vld [vmem:[%s2903_s4 + $0x18] sm:$0xff] }
   0xf   :  { %123 = vperm.xlu1 %1850, %v69_v20   ;;  %v1857_v48 = vld [vmem:[%s2902_s1 + $0x30] sm:$0xff]   ;;  %v421_v49 = vld [vmem:[%s2903_s4] sm:$0xff]  ;;  %v422_v50 = vld [vmem:[%s2903_s4 + $0x8] sm:$0xff] }
  0x10   :  { %v451_v51 = vld [vmem:[%s2903_s4 + $0xf0] sm:$0xff]  ;;  %v452_v52 = vld [vmem:[%s2903_s4 + $0xf8] sm:$0xff]  ;;  %v449_v54 = vld [vmem:[%s2903_s4 + $0xe0] sm:$0xff] }
  0x11   :  { %v1858_v53 = vld [vmem:[%s2902_s1 + $0x38] sm:$0xff]   ;;  %v450_v55 = vld [vmem:[%s2903_s4 + $0xe8] sm:$0xff]  ;;  %v447_v56 = vld [vmem:[%s2903_s4 + $0xd0] sm:$0xff] }
  0x12   :  { %108 = vperm.xlu0 %1849, %v66_v21   ;;  %v448_v57 = vld [vmem:[%s2903_s4 + $0xd8] sm:$0xff]  ;;  %v445_v58 = vld [vmem:[%s2903_s4 + $0xc0] sm:$0xff]  ;;  %v446_v59 = vld [vmem:[%s2903_s4 + $0xc8] sm:$0xff] }
  0x13   :  { %113 = vperm.xlu1 %1850, %v67_v22   ;;  %v443_v60 = vld [vmem:[%s2903_s4 + $0xb0] sm:$0xff]  ;;  %v444_v61 = vld [vmem:[%s2903_s4 + $0xb8] sm:$0xff]  ;;  %v441_v62 = vld [vmem:[%s2903_s4 + $0xa0] sm:$0xff] }
  0x14   :  { %v442_v63 = vld [vmem:[%s2903_s4 + $0xa8] sm:$0xff]  ;;  %v439_v1 = vld [vmem:[%s2903_s4 + $0x90] sm:$0xff]  ;;  %v440_v2 = vld [vmem:[%s2903_s4 + $0x98] sm:$0xff] }
  0x15   :  { %1789 = vmatmul.mubr.msk.bf16.gmra.mxu0 %vm196_vm1, %v1852_v23  ;;  %v437_v3 = vld [vmem:[%s2903_s4 + $0x80] sm:$0xff]  ;;  %v438_v4 = vld [vmem:[%s2903_s4 + $0x88] sm:$0xff]  ;;  %v1044_v5 = vld [vmem:[%s2904_s6 + $0x70] sm:$0xff] }
  0x16   :  { %98 = vperm.xlu0 %1849, %v64_v24   ;;  %280 = vmatprep.mubr.bf16.mxu0 %v1931_v0  ;;  %v1045_v6 = vld [vmem:[%s2904_s6 + $0x78] sm:$0xff]  ;;  %v1042_v7 = vld [vmem:[%s2904_s6 + $0x60] sm:$0xff]  ;;  %v1043_v8 = vld [vmem:[%s2904_s6 + $0x68] sm:$0xff] }
  0x17   :  { %103 = vperm.xlu1 %1850, %v65_v25   ;;  %v1040_v9 = vld [vmem:[%s2904_s6 + $0x50] sm:$0xff]  ;;  %v1041_v10 = vld [vmem:[%s2904_s6 + $0x58] sm:$0xff]  ;;  %v1038_v11 = vld [vmem:[%s2904_s6 + $0x40] sm:$0xff] }
  0x18   :  { %v1039_v12 = vld [vmem:[%s2904_s6 + $0x48] sm:$0xff]  ;;  %v1036_v13 = vld [vmem:[%s2904_s6 + $0x30] sm:$0xff]  ;;  %v1037_v14 = vld [vmem:[%s2904_s6 + $0x38] sm:$0xff] }
  0x19   :  { %v1034_v15 = vld [vmem:[%s2904_s6 + $0x20] sm:$0xff]  ;;  %v1035_v16 = vld [vmem:[%s2904_s6 + $0x28] sm:$0xff]  ;;  %v1032_v17 = vld [vmem:[%s2904_s6 + $0x10] sm:$0xff] }
  0x1a   :  { %88 = vperm.xlu0 %1849, %v62_v26   ;;  %v1033_v18 = vld [vmem:[%s2904_s6 + $0x18] sm:$0xff]  ;;  %v1030_v19 = vld [vmem:[%s2904_s6] sm:$0xff]  ;;  %v1031_v20 = vld [vmem:[%s2904_s6 + $0x8] sm:$0xff] }
  0x1b   :  { %93 = vperm.xlu1 %1850, %v63_v27   ;;  %v1060_v21 = vld [vmem:[%s2904_s6 + $0xf0] sm:$0xff]  ;;  %v1061_v22 = vld [vmem:[%s2904_s6 + $0xf8] sm:$0xff]  ;;  %v1058_v23 = vld [vmem:[%s2904_s6 + $0xe0] sm:$0xff] }
  0x1c   :  { %v1059_v24 = vld [vmem:[%s2904_s6 + $0xe8] sm:$0xff]  ;;  %v1056_v25 = vld [vmem:[%s2904_s6 + $0xd0] sm:$0xff]  ;;  %v1057_v26 = vld [vmem:[%s2904_s6 + $0xd8] sm:$0xff] }
  0x1d   :  { %1790 = vmatmul.mubr.msk.bf16.gmra.mxu0 %vm196_vm1, %v1853_v28  ;;  %v1054_v27 = vld [vmem:[%s2904_s6 + $0xc0] sm:$0xff]  ;;  %v1055_v28 = vld [vmem:[%s2904_s6 + $0xc8] sm:$0xff] }
  0x1e   :  { %78 = vperm.xlu0 %1849, %v60_v29   ;;  %290 = vmatprep.mubr.bf16.mxu0 %v1931_v0  ;;  %v1052_v29 = vld [vmem:[%s2904_s6 + $0xb0] sm:$0xff] }
  0x1f   :  { %83 = vperm.xlu1 %1850, %v61_v30   ;;  %v1053_v30 = vld [vmem:[%s2904_s6 + $0xb8] sm:$0xff] }
  0x22   :  { %525 = vperm.xlu0 %1849, %v435_v31   ;;  %v1050_v31 = vld [vmem:[%s2904_s6 + $0xa0] sm:$0xff] }
  0x23   :  { %530 = vperm.xlu1 %1850, %v436_v32   ;;  %v1051_v32 = vld [vmem:[%s2904_s6 + $0xa8] sm:$0xff] }
  0x25   :  { %1791 = vmatmul.mubr.msk.bf16.gmra.mxu0 %vm196_vm1, %v1854_v33  ;;  %v1048_v33 = vld [vmem:[%s2904_s6 + $0x90] sm:$0xff] }
  0x26   :  { %515 = vperm.xlu0 %1849, %v433_v34   ;;  %300 = vmatprep.mubr.bf16.mxu0 %v1931_v0  ;;  %v1049_v34 = vld [vmem:[%s2904_s6 + $0x98] sm:$0xff] }
  0x27   :  { %520 = vperm.xlu1 %1850, %v434_v35   ;;  %v1046_v35 = vld [vmem:[%s2904_s6 + $0x80] sm:$0xff] }
  0x2a   :  { %505 = vperm.xlu0 %1849, %v431_v36   ;;  %v1047_v36 = vld [vmem:[%s2904_s6 + $0x88] sm:$0xff] }
  0x2b   :  { %510 = vperm.xlu1 %1850, %v432_v37  }
  0x2d   :  { %1792 = vmatmul.mubr.msk.bf16.gmra.mxu0 %vm196_vm1, %v1855_v38 }
  0x2e   :  { %495 = vperm.xlu0 %1849, %v429_v39   ;;  %310 = vmatprep.mubr.bf16.mxu0 %v1931_v0 }
  0x2f   :  { %500 = vperm.xlu1 %1850, %v430_v40  }
  0x32   :  { %485 = vperm.xlu0 %1849, %v427_v41  }
  0x33   :  { %490 = vperm.xlu1 %1850, %v428_v42  }
  0x35   :  { %1793 = vmatmul.mubr.msk.bf16.gmra.mxu0 %vm196_vm1, %v1856_v43 }
  0x36   :  { %475 = vperm.xlu0 %1849, %v425_v44   ;;  %320 = vmatprep.mubr.bf16.mxu0 %v1931_v0 }
  0x37   :  { %480 = vperm.xlu1 %1850, %v426_v45  }
  0x3a   :  { %465 = vperm.xlu0 %1849, %v423_v46  }
  0x3b   :  { %470 = vperm.xlu1 %1850, %v424_v47  }
  0x3d   :  { %1794 = vmatmul.mubr.msk.bf16.gmra.mxu0 %vm196_vm1, %v1857_v48 }
  0x3e   :  { %455 = vperm.xlu0 %1849, %v421_v49   ;;  %330 = vmatprep.mubr.bf16.mxu0 %v1931_v0 }
  0x3f   :  { %460 = vperm.xlu1 %1850, %v422_v50  }
  0x42   :  { %605 = vperm.xlu0 %1849, %v451_v51  }
  0x43   :  { %610 = vperm.xlu1 %1850, %v452_v52  }
  0x45   :  { %1795 = vmatmul.mubr.msk.bf16.gmra.mxu0 %vm196_vm1, %v1858_v53 }
  0x46   :  { %595 = vperm.xlu0 %1849, %v449_v54  }
  0x47   :  { %600 = vperm.xlu1 %1850, %v450_v55  }
  0x4a   :  { %585 = vperm.xlu0 %1849, %v447_v56  }
  0x4b   :  { %590 = vperm.xlu1 %1850, %v448_v57  }
  0x4e   :  { %575 = vperm.xlu0 %1849, %v445_v58  }
  0x4f   :  { %580 = vperm.xlu1 %1850, %v446_v59  }
  0x52   :  { %565 = vperm.xlu0 %1849, %v443_v60  }
  0x53   :  { %570 = vperm.xlu1 %1850, %v444_v61  }
  0x56   :  { %555 = vperm.xlu0 %1849, %v441_v62  }
  0x57   :  { %560 = vperm.xlu1 %1850, %v442_v63  }
  0x5a   :  { %545 = vperm.xlu0 %1849, %v439_v1  }
  0x5b   :  { %550 = vperm.xlu1 %1850, %v440_v2  }
  0x5e   :  { %535 = vperm.xlu0 %1849, %v437_v3  }
  0x5f   :  { %540 = vperm.xlu1 %1850, %v438_v4  }
  0x62   :  { %1134 = vperm.xlu0 %1849, %v1044_v5  }
  0x63   :  { %1139 = vperm.xlu1 %1850, %v1045_v6  }
  0x66   :  { %1124 = vperm.xlu0 %1849, %v1042_v7  }
  0x67   :  { %1129 = vperm.xlu1 %1850, %v1043_v8  }
  0x6a   :  { %1114 = vperm.xlu0 %1849, %v1040_v9  }
  0x6b   :  { %1119 = vperm.xlu1 %1850, %v1041_v10  }
  0x6e   :  { %1104 = vperm.xlu0 %1849, %v1038_v11  }
  0x6f   :  { %1109 = vperm.xlu1 %1850, %v1039_v12  }
  0x72   :  { %1094 = vperm.xlu0 %1849, %v1036_v13  }
  0x73   :  { %1099 = vperm.xlu1 %1850, %v1037_v14  }
  0x76   :  { %1084 = vperm.xlu0 %1849, %v1034_v15  }
  0x77   :  { %1089 = vperm.xlu1 %1850, %v1035_v16  }
  0x7a   :  { %1074 = vperm.xlu0 %1849, %v1032_v17  }
  0x7b   :  { %1079 = vperm.xlu1 %1850, %v1033_v18  }
  0x7d   :  { %v2286_v37 = vpop.permute.xlu0 %148  ;;  %v2288_v38 = vpop.permute.xlu1 %138 }
  0x7e   :  { %1064 = vperm.xlu0 %1849, %v1030_v19  }
  0x7f   :  { %1069 = vperm.xlu1 %1850, %v1031_v20  }
  0x81   :  { %v2290_v39 = vpop.permute.xlu0 %153 }
  0x82   :  { %1214 = vperm.xlu0 %1849, %v1060_v21   ;;  %v2292_v40 = vpop.permute.xlu1 %143 }
  0x83   :  { %1219 = vperm.xlu1 %1850, %v1061_v22  }
  0x85   :  { %v2294_v41 = vpop.permute.xlu0 %128 }
  0x86   :  { %1204 = vperm.xlu0 %1849, %v1058_v23   ;;  %v2296_v42 = vpop.permute.xlu1 %133 }
  0x87   :  { %1209 = vperm.xlu1 %1850, %v1059_v24  }
  0x89   :  { %v2298_v43 = vpop.permute.xlu0 %118 }
  0x8a   :  { %1194 = vperm.xlu0 %1849, %v1056_v25   ;;  %v2300_v44 = vpop.permute.xlu1 %123 }
  0x8b   :  { %1199 = vperm.xlu1 %1850, %v1057_v26  }
  0x8d   :  { %v2302_v45 = vpop.permute.xlu0 %108 }
  0x8e   :  { %1184 = vperm.xlu0 %1849, %v1054_v27   ;;  %v2304_v46 = vpop.permute.xlu1 %113 }
  0x8f   :  { %1189 = vperm.xlu1 %1850, %v1055_v28  }
  0x91   :  { %v2306_v47 = vpop.permute.xlu0 %98 }
  0x92   :  { %1174 = vperm.xlu0 %1849, %v1052_v29   ;;  %v2308_v48 = vpop.permute.xlu1 %103 }
  0x93   :  { %1179 = vperm.xlu1 %1850, %v1053_v30  }
  0x95   :  { %v89_v49 = vpop.permute.xlu0 %88 }
  0x96   :  { %1164 = vperm.xlu0 %1849, %v1050_v31   ;;  %v94_v50 = vpop.permute.xlu1 %93 }
  0x97   :  { %1169 = vperm.xlu1 %1850, %v1051_v32  }
  0x99   :  { %v79_v52 = vpop.permute.xlu0 %78 }
  0x9a   :  { %1154 = vperm.xlu0 %1849, %v1048_v33   ;;  %v84_v55 = vpop.permute.xlu1 %83 }
  0x9b   :  { %1159 = vperm.xlu1 %1850, %v1049_v34  }
  0x9e   :  { %1144 = vperm.xlu0 %1849, %v1046_v35  }
  0x9f   :  { %1149 = vperm.xlu1 %1850, %v1047_v36  }
  0xcd   :  { %v262_v51 = vpop.f32.mrf.mxu0 }
  0xce   :  { %v263_v54 = vadd.f32 %v262_v51, %v79_v52 }
  0xcf   :  { %v264_v53 = vpop.f32.mrf.mxu0 }
  0xd0   :  { %v265_v57 = vadd.f32 %v264_v53, %v79_v52  ;;  %v341_v60 = vmax.f32 %v263_v54, 0.0 }
  0xd1   :  { %v266_v56 = vpop.f32.mrf.mxu0 }
  0xd2   :  { %v267_v58 = vadd.f32 %v266_v56, %v84_v55  ;;  %v342_v1 = vmax.f32 %v265_v57, 0.0 }
  0xd3   :  { %v268_v59 = vpop.f32.mrf.mxu0 }
  0xd4   :  { %v343_v61 = vmax.f32 %v267_v58, 0.0  ;;  %v269_v62 = vadd.f32 %v268_v59, %v84_v55 }
  0xd5   :  { %v272_v63 = vpop.f32.mrf.mxu0 }
  0xd6   :  { %v2310_v2 = vpack.c.bf16 %v343_v61, %v341_v60  ;;  %v344_v3 = vmax.f32 %v269_v62, 0.0  ;;  %v273_v6 = vadd.f32 %v272_v63, %v89_v49 }
  0xd7   :  { %v274_v4 = vpop.f32.mrf.mxu0 }
  0xd8   :  { %v2312_v5 = vpack.c.bf16 %v344_v3, %v342_v1  ;;  %v275_v8 = vadd.f32 %v274_v4, %v89_v49  ;;  %v345_v11 = vmax.f32 %v273_v6, 0.0 }
  0xd9   :  { %v276_v7 = vpop.f32.mrf.mxu0 }
  0xda   :  { %v277_v9 = vadd.f32 %v276_v7, %v94_v50  ;;  %v346_v15 = vmax.f32 %v275_v8, 0.0 }
  0xdb   :  { %v278_v10 = vpop.f32.mrf.mxu0 }
  0xdc   :  { %v347_v12 = vmax.f32 %v277_v9, 0.0  ;;  %v279_v13 = vadd.f32 %v278_v10, %v94_v50 }
  0xdd   :  { %v2314_v14 = vpop.f32.mrf.mxu0 }
  0xde   :  { %v2316_v16 = vpack.c.bf16 %v347_v12, %v345_v11  ;;  %v348_v17 = vmax.f32 %v279_v13, 0.0 }
  0xdf   :  { %v2318_v18 = vpop.f32.mrf.mxu0 }
  0xe0   :  { %v2320_v19 = vpack.c.bf16 %v348_v17, %v346_v15 }
  0xe1   :  { %v2322_v20 = vpop.f32.mrf.mxu0 }
  0xe3   :  { %v2324_v21 = vpop.f32.mrf.mxu0 }
  0xe5   :  { %v2326_v22 = vpop.f32.mrf.mxu0 }
  0xe7   :  { %v294_v23 = vpop.f32.mrf.mxu0 }
  0xe9   :  { %v296_v24 = vpop.f32.mrf.mxu0 }
  0xeb   :  { %v298_v25 = vpop.f32.mrf.mxu0 }
  0xed   :  { %v302_v26 = vpop.f32.mrf.mxu0 }
  0xef   :  { %v304_v27 = vpop.f32.mrf.mxu0 }
  0xf1   :  { %v306_v28 = vpop.f32.mrf.mxu0 }
  0xf3   :  { %v308_v29 = vpop.f32.mrf.mxu0 }
  0xf5   :  { %v312_v30 = vpop.f32.mrf.mxu0 }
  0xf6   :  { %v313_v13 = vadd.f32 %v312_v30, %v2294_v41 }
  0xf7   :  { %v314_v31 = vpop.f32.mrf.mxu0 }
  0xf8   :  { %v315_v7 = vadd.f32 %v314_v31, %v2294_v41  ;;  %v307_v31 = vadd.f32 %v306_v28, %v2300_v44  ;;  %v295_v41 = vadd.f32 %v294_v23, %v2302_v45 }
  0xf9   :  { %v316_v32 = vpop.f32.mrf.mxu0 }
  0xfa   :  { %v317_v9 = vadd.f32 %v316_v32, %v2296_v42  ;;  %v362_v17 = vmax.f32 %v315_v7, 0.0  ;;  %v354_v23 = vmax.f32 %v295_v41, 0.0  ;;  %v2426_v7 = vpop.permute.xlu1 %530 }
  0xfb   :  { %v318_v33 = vpop.f32.mrf.mxu0 }
  0xfc   :  { %v319_v62 = vadd.f32 %v318_v33, %v2296_v42  ;;  %v363_v33 = vmax.f32 %v317_v9, 0.0  ;;  %v299_v42 = vadd.f32 %v298_v25, %v2304_v46  ;;  %v293_v25 = vadd.f32 %v2326_v22, %v2302_v45 }
  0xfd   :  { %v322_v34 = vpop.f32.mrf.mxu0 }
  0xfe   :  { %v323_v4 = vadd.f32 %v322_v34, %v2288_v38  ;;  %v356_v28 = vmax.f32 %v299_v42, 0.0 }
  0xff   :  { %v324_v35 = vpop.f32.mrf.mxu0 }
 0x100   :  { %v325_v58 = vadd.f32 %v324_v35, %v2288_v38  ;;  %v365_v15 = vmax.f32 %v323_v4, 0.0  ;;  %v305_v38 = vadd.f32 %v304_v27, %v2298_v43  ;;  %v297_v27 = vadd.f32 %v296_v24, %v2304_v46  ;;  %v1874_v4 = vld [vmem:[%s2905_s3 + $0x78] sm:$0xff]  }
 0x101   :  { %v326_v36 = vpop.f32.mrf.mxu0  ;;  %v287_v46 = vadd.f32 %v2322_v20, %v2308_v48  ;;  %v1866_v20 = vld [vmem:[%s2905_s3 + $0x38] sm:$0xff]  }
 0x102   :  { %v327_v60 = vadd.f32 %v326_v36, %v2292_v40  ;;  %v366_v8 = vmax.f32 %v325_v58, 0.0  ;;  %v361_v36 = vmax.f32 %v313_v13, 0.0  ;;  %v358_v30 = vmax.f32 %v305_v38, 0.0 }
 0x103   :  { %v328_v49 = vpop.f32.mrf.mxu0  ;;  %v355_v24 = vmax.f32 %v297_v27, 0.0  ;;  %v351_v22 = vmax.f32 %v287_v46, 0.0 }
 0x104   :  { %v329_v53 = vadd.f32 %v328_v49, %v2292_v40  ;;  %v367_v10 = vmax.f32 %v327_v60, 0.0  ;;  %v364_v40 = vmax.f32 %v319_v62, 0.0  ;;  %v359_v49 = vmax.f32 %v307_v31, 0.0  ;;  %v1868_v60 = vld [vmem:[%s2905_s3 + $0x48] sm:$0xff]   ;;  %v1870_v62 = vld [vmem:[%s2905_s3 + $0x58] sm:$0xff]  }
 0x105   :  { %v332_v50 = vpop.f32.mrf.mxu0 }
 0x106   :  { %v333_v56 = vadd.f32 %v332_v50, %v2286_v37  ;;  %v368_v63 = vmax.f32 %v329_v53, 0.0  ;;  %v385_v34 = vpack.c.bf16 %v367_v10, %v365_v15  ;;  %v384_v35 = vpack.c.bf16 %v364_v40, %v362_v17 }
 0x107   :  { %v334_v51 = vpop.f32.mrf.mxu0  ;;  %v383_v50 = vpack.c.bf16 %v363_v33, %v361_v36 }
 0x108   :  { %v335_v54 = vadd.f32 %v334_v51, %v2286_v37  ;;  %v369_v6 = vmax.f32 %v333_v56, 0.0  ;;  %v386_v12 = vpack.c.bf16 %v368_v63, %v366_v8  ;;  %v1871_v63 = vld [vmem:[%s2905_s3 + $0x60] sm:$0xff]  }
 0x109   :  { %v336_v52 = vpop.f32.mrf.mxu0 }
 0x10a   :  { %v337_v55 = vadd.f32 %v336_v52, %v2290_v39  ;;  %v370_v1 = vmax.f32 %v335_v54, 0.0  ;;  %v380_v54 = vpack.c.bf16 %v356_v28, %v354_v23 }
 0x10b   :  { %v338_v57 = vpop.f32.mrf.mxu0 }
 0x10c   :  { %v339_v59 = vadd.f32 %v338_v57, %v2290_v39  ;;  %v371_v61 = vmax.f32 %v337_v55, 0.0  ;;  %v309_v39 = vadd.f32 %v308_v29, %v2300_v44  ;;  %v303_v29 = vadd.f32 %v302_v26, %v2298_v43 }
 0x10d   :  { %v289_v44 = vadd.f32 %v2324_v21, %v2308_v48  ;;  %v285_v43 = vadd.f32 %v2318_v18, %v2306_v47  ;;  %v283_v21 = vadd.f32 %v2314_v14, %v2306_v47  ;;  %v353_v55 = vmax.f32 %v293_v25, 0.0  ;;  %v1859_v47 = vld [vmem:[%s2905_s3] sm:$0xff]   ;;  %v1860_v48 = vld [vmem:[%s2905_s3 + $0x8] sm:$0xff]  }
 0x10e   :  { %v372_v3 = vmax.f32 %v339_v59, 0.0  ;;  %v387_v11 = vpack.c.bf16 %v371_v61, %v369_v6  ;;  %v360_v32 = vmax.f32 %v309_v39, 0.0  ;;  %v357_v52 = vmax.f32 %v303_v29, 0.0  ;;  %v1863_v14 = vld [vmem:[%s2905_s3 + $0x20] sm:$0xff]   ;;  %v1869_v61 = vld [vmem:[%s2905_s3 + $0x50] sm:$0xff]   ;;  %v2424_v6 = vpop.permute.xlu0 %525 }
 0x10f   :  { %v352_v53 = vmax.f32 %v289_v44, 0.0  ;;  %v350_v45 = vmax.f32 %v285_v43, 0.0  ;;  %v379_v56 = vpack.c.bf16 %v355_v24, %v353_v55  ;;  %v349_v18 = vmax.f32 %v283_v21, 0.0  ;;  %v1867_v59 = vld [vmem:[%s2905_s3 + $0x40] sm:$0xff]  }
 0x110   :  { %v388_v37 = vpack.c.bf16 %v372_v3, %v370_v1  ;;  %v382_v51 = vpack.c.bf16 %v360_v32, %v358_v30  ;;  %v381_v26 = vpack.c.bf16 %v359_v49, %v357_v52  ;;  %v1872_v1 = vld [vmem:[%s2905_s3 + $0x68] sm:$0xff]   ;;  %v1873_v3 = vld [vmem:[%s2905_s3 + $0x70] sm:$0xff]  }
 0x111   :  { %v378_v57 = vpack.c.bf16 %v352_v53, %v350_v45  ;;  %v377_v58 = vpack.c.bf16 %v351_v22, %v349_v18 }
 0x112   :  { %709 = vmatprep.subr.bf16.mxu1 %v388_v37  ;;  %v2428_v8 = vpop.permute.xlu0 %515  ;;  %v2430_v37 = vpop.permute.xlu1 %520 }
 0x113   :  { %710 = vmatpush1.bf16.msra.mxu1 %v387_v11 }
 0x114   :  { %711 = vmatprep.subr.bf16.mxu1 %v386_v12 }
 0x116   :  { %v2432_v9 = vpop.permute.xlu0 %505  ;;  %v2434_v10 = vpop.permute.xlu1 %510 }
 0x117   :  { %712 = vmatpush1.bf16.msra.mxu1 %v385_v34 }
 0x118   :  { %713 = vmatprep.subr.bf16.mxu1 %v384_v35 }
 0x11a   :  { %v2436_v11 = vpop.permute.xlu0 %495 }
 0x11b   :  { %714 = vmatpush1.bf16.msra.mxu1 %v383_v50 }
 0x11c   :  { %715 = vmatprep.subr.bf16.mxu1 %v382_v51 }
 0x11e   :  { %v2440_v39 = vpop.permute.xlu0 %485 }
 0x11f   :  { %716 = vmatpush1.bf16.msra.mxu1 %v381_v26 }
 0x120   :  { %717 = vmatprep.subr.bf16.mxu1 %v380_v54 }
 0x122   :  { %v2444_v12 = vpop.permute.xlu0 %475 }
 0x123   :  { %718 = vmatpush1.bf16.msra.mxu1 %v379_v56 }
 0x124   :  { %719 = vmatprep.subr.bf16.mxu1 %v378_v57 }
 0x126   :  { %v466_v15 = vpop.permute.xlu0 %465 }
 0x127   :  { %720 = vmatpush1.bf16.msra.mxu1 %v377_v58 }
 0x128   :  { %721 = vmatprep.subr.bf16.mxu1 %v2320_v19  ;;  %v1865_v19 = vld [vmem:[%s2905_s3 + $0x30] sm:$0xff]  }
 0x12a   :  { %v456_v31 = vpop.permute.xlu0 %455 }
 0x12b   :  { %722 = vmatpush1.bf16.msra.mxu1 %v2316_v16  ;;  %v1864_v16 = vld [vmem:[%s2905_s3 + $0x28] sm:$0xff]  }
 0x12c   :  { %723 = vmatprep.subr.bf16.mxu1 %v2312_v5  ;;  %v1861_v5 = vld [vmem:[%s2905_s3 + $0x10] sm:$0xff]  }
 0x12f   :  { %724 = vmatpush1.bf16.msra.mxu1 %v2310_v2  ;;  %v1862_v2 = vld [vmem:[%s2905_s3 + $0x18] sm:$0xff]  }
 0x132   :  { %742 = vmatmul.mubr.bf16.vlgmr.msra.gmra.mxu1 %v1859_v47  ;;  %v2464_v47 = vpop.permute.xlu0 %605 }
 0x133   :  { %751 = vmatprep.mubr.bf16.mxu1 %v1931_v0 }
 0x13a   :  { %752 = vmatmul.mubr.bf16.gmra.mxu1 %v1860_v48 }
 0x13b   :  { %761 = vmatprep.mubr.bf16.mxu1 %v1931_v0 }
 0x142   :  { %762 = vmatmul.mubr.bf16.gmra.mxu1 %v1861_v5 }
 0x143   :  { %771 = vmatprep.mubr.bf16.mxu1 %v1931_v0 }
 0x14a   :  { %772 = vmatmul.mubr.bf16.gmra.mxu1 %v1862_v2 }
 0x14b   :  { %781 = vmatprep.mubr.bf16.mxu1 %v1931_v0 }
 0x152   :  { %782 = vmatmul.mubr.bf16.gmra.mxu1 %v1863_v14 }
 0x153   :  { %791 = vmatprep.mubr.bf16.mxu1 %v1931_v0 }
 0x15a   :  { %792 = vmatmul.mubr.bf16.gmra.mxu1 %v1864_v16  ;;  %v2474_v16 = vpop.permute.xlu0 %595 }
 0x15b   :  { %801 = vmatprep.mubr.bf16.mxu1 %v1931_v0 }
 0x162   :  { %802 = vmatmul.mubr.bf16.gmra.mxu1 %v1865_v19 }
 0x163   :  { %811 = vmatprep.mubr.bf16.mxu1 %v1931_v0 }
 0x16a   :  { %812 = vmatmul.mubr.bf16.gmra.mxu1 %v1866_v20 }
 0x16b   :  { %821 = vmatprep.mubr.bf16.mxu1 %v1931_v0 }
 0x172   :  { %822 = vmatmul.mubr.bf16.gmra.mxu1 %v1867_v59 }
 0x173   :  { %831 = vmatprep.mubr.bf16.mxu1 %v1931_v0 }
 0x17a   :  { %832 = vmatmul.mubr.bf16.gmra.mxu1 %v1868_v60 }
 0x17b   :  { %841 = vmatprep.mubr.bf16.mxu1 %v1931_v0 }
 0x182   :  { %842 = vmatmul.mubr.bf16.gmra.mxu1 %v1869_v61  ;;  %v1877_v61 = vld [vmem:[%s2906_s5 + $0x4] ss:$8 sps:$4 sm:$0xff]  }
 0x183   :  { %851 = vmatprep.mubr.bf16.mxu1 %v1931_v0  ;;  %1414 = vmatprep.mubr.bf16.mxu0 %v1877_v61 }
 0x18a   :  { %852 = vmatmul.mubr.bf16.gmra.mxu1 %v1870_v62  ;;  %v2485_v62 = vpop.permute.xlu0 %585 }
 0x18b   :  { %861 = vmatprep.mubr.bf16.mxu1 %v1931_v0 }
 0x192   :  { %862 = vmatmul.mubr.bf16.gmra.mxu1 %v1871_v63 }
 0x193   :  { %871 = vmatprep.mubr.bf16.mxu1 %v1931_v0 }
 0x19a   :  { %872 = vmatmul.mubr.bf16.gmra.mxu1 %v1872_v1 }
 0x19b   :  { %881 = vmatprep.mubr.bf16.mxu1 %v1931_v0 }
 0x1a2   :  { %882 = vmatmul.mubr.bf16.gmra.mxu1 %v1873_v3 }
 0x1a3   :  { %891 = vmatprep.mubr.bf16.mxu1 %v1931_v0  ;;  %v2438_v0 = vpop.permute.xlu1 %500 }
 0x1a7   :  { %v2442_v40 = vpop.permute.xlu1 %490 }
 0x1aa   :  { %892 = vmatmul.mubr.bf16.gmra.mxu1 %v1874_v4 }
 0x1ab   :  { %v2446_v13 = vpop.permute.xlu1 %480 }
 0x1af   :  { %v471_v38 = vpop.permute.xlu1 %470 }
 0x1b3   :  { %v461_v42 = vpop.permute.xlu1 %460 }
 0x1b7   :  { %v2468_v5 = vpop.permute.xlu1 %610 }
 0x1bb   :  { %v2478_v20 = vpop.permute.xlu1 %600 }
 0x1bf   :  { %v2489_v1 = vpop.permute.xlu1 %590 }
 0x1f2   :  { %v743_v17 = vpop.f32.mrf.mxu1 }
 0x1f3   :  { %v744_v34 = vadd.f32 %v743_v17, %v456_v31  ;;  %v2493_v17 = vpop.permute.xlu1 %580 }
 0x1f4   :  { %v745_v33 = vpop.f32.mrf.mxu1  ;;  %2927 = vst [vmem:[#allocation4_spill] sm:$0xff] %v2493_v17 }
 0x1f5   :  { %v746_v35 = vadd.f32 %v745_v33, %v456_v31  ;;  %v902_v41 = vmax.f32 %v744_v34, 0.0 }
 0x1f6   :  { %v747_v32 = vpop.f32.mrf.mxu1 }
 0x1f7   :  { %v748_v29 = vadd.f32 %v747_v32, %v461_v42  ;;  %v903_v50 = vmax.f32 %v746_v35, 0.0  ;;  %v2497_v32 = vpop.permute.xlu1 %570 }
 0x1f8   :  { %v749_v36 = vpop.f32.mrf.mxu1  ;;  %2929 = vst [vmem:[#allocation6_spill] sm:$0xff] %v2497_v32 }
 0x1f9   :  { %v904_v30 = vmax.f32 %v748_v29, 0.0  ;;  %v750_v27 = vadd.f32 %v749_v36, %v461_v42 }
 0x1fa   :  { %v753_v49 = vpop.f32.mrf.mxu1 }
 0x1fb   :  { %v2448_v44 = vpack.c.bf16 %v904_v30, %v902_v41  ;;  %v905_v28 = vmax.f32 %v750_v27, 0.0  ;;  %v754_v52 = vadd.f32 %v753_v49, %v466_v15  ;;  %v2501_v30 = vpop.permute.xlu1 %560 }
 0x1fc   :  { %v755_v51 = vpop.f32.mrf.mxu1  ;;  %2931 = vst [vmem:[#allocation8_spill] sm:$0xff] %v2501_v30 }
 0x1fd   :  { %v2450_v25 = vpack.c.bf16 %v905_v28, %v903_v50  ;;  %v756_v23 = vadd.f32 %v755_v51, %v466_v15  ;;  %v906_v26 = vmax.f32 %v754_v52, 0.0  ;;  %v2491_v15 = vpop.permute.xlu0 %575 }
 0x1fe   :  { %v757_v43 = vpop.f32.mrf.mxu1  ;;  %2926 = vst [vmem:[#allocation3_spill] sm:$0xff] %v2491_v15 }
 0x1ff   :  { %v758_v46 = vadd.f32 %v757_v43, %v471_v38  ;;  %v907_v55 = vmax.f32 %v756_v23, 0.0  ;;  %v2508_v23 = vpop.permute.xlu1 %550 }
 0x200   :  { %v759_v24 = vpop.f32.mrf.mxu1 }
 0x201   :  { %v908_v53 = vmax.f32 %v758_v46, 0.0  ;;  %v760_v54 = vadd.f32 %v759_v24, %v471_v38  ;;  %v2495_v34 = vpop.permute.xlu0 %565 }
 0x202   :  { %v2452_v21 = vpop.f32.mrf.mxu1  ;;  %2928 = vst [vmem:[#allocation5_spill] sm:$0xff] %v2495_v34 }
 0x203   :  { %v2454_v45 = vpack.c.bf16 %v908_v53, %v906_v26  ;;  %v909_v22 = vmax.f32 %v760_v54, 0.0 }
 0x204   :  { %v2456_v56 = vpop.f32.mrf.mxu1 }
 0x205   :  { %v2458_v57 = vpack.c.bf16 %v909_v22, %v907_v55  ;;  %v2499_v36 = vpop.permute.xlu0 %555 }
 0x206   :  { %v2460_v18 = vpop.f32.mrf.mxu1  ;;  %2930 = vst [vmem:[#allocation7_spill] sm:$0xff] %v2499_v36 }
 0x208   :  { %v2462_v58 = vpop.f32.mrf.mxu1 }
 0x209   :  { %v2503_v50 = vpop.permute.xlu0 %545 }
 0x20a   :  { %v2466_v48 = vpop.f32.mrf.mxu1 }
 0x20c   :  { %v2470_v2 = vpop.f32.mrf.mxu1 }
 0x20d   :  { %v536_v30 = vpop.permute.xlu0 %535 }
 0x20e   :  { %v2472_v14 = vpop.f32.mrf.mxu1 }
 0x210   :  { %v2476_v19 = vpop.f32.mrf.mxu1 }
 0x212   :  { %v2480_v59 = vpop.f32.mrf.mxu1 }
 0x214   :  { %v785_v60 = vpop.f32.mrf.mxu1 }
 0x216   :  { %v2487_v63 = vpop.f32.mrf.mxu1 }
 0x218   :  { %v789_v3 = vpop.f32.mrf.mxu1 }
 0x21a   :  { %v793_v4 = vpop.f32.mrf.mxu1 }
 0x21c   :  { %v795_v38 = vpop.f32.mrf.mxu1 }
 0x21e   :  { %v797_v31 = vpop.f32.mrf.mxu1 }
 0x220   :  { %v799_v33 = vpop.f32.mrf.mxu1 }
 0x221   :  { %v800_v61 = vadd.f32 %v799_v33, %v2434_v10 }
 0x222   :  { %v803_v42 = vpop.f32.mrf.mxu1 }
 0x224   :  { %v805_v35 = vpop.f32.mrf.mxu1 }
 0x225   :  { %v806_v26 = vadd.f32 %v805_v35, %v2428_v8 }
 0x226   :  { %v807_v29 = vpop.f32.mrf.mxu1 }
 0x227   :  { %v808_v54 = vadd.f32 %v807_v29, %v2430_v37  ;;  %v798_v29 = vadd.f32 %v797_v31, %v2434_v10 }
 0x228   :  { %v809_v41 = vpop.f32.mrf.mxu1 }
 0x229   :  { %v810_v51 = vadd.f32 %v809_v41, %v2430_v37  ;;  %v790_v37 = vadd.f32 %v789_v3, %v2438_v0 }
 0x22a   :  { %v813_v27 = vpop.f32.mrf.mxu1 }
 0x22b   :  { %v814_v46 = vadd.f32 %v813_v27, %v2424_v6  ;;  %v929_v41 = vmax.f32 %v810_v51, 0.0  ;;  %v927_v27 = vmax.f32 %v806_v26, 0.0  ;;  %v924_v26 = vmax.f32 %v798_v29, 0.0 }
 0x22c   :  { %v815_v49 = vpop.f32.mrf.mxu1  ;;  %v774_v29 = vadd.f32 %v2466_v48, %v2440_v39 }
 0x22d   :  { %v816_v52 = vadd.f32 %v815_v49, %v2424_v6  ;;  %v930_v34 = vmax.f32 %v814_v46, 0.0  ;;  %v796_v6 = vadd.f32 %v795_v38, %v2432_v9  ;;  %v786_v38 = vadd.f32 %v785_v60, %v2436_v11 }
 0x22e   :  { %v817_v28 = vpop.f32.mrf.mxu1 }
 0x22f   :  { %v818_v43 = vadd.f32 %v817_v28, %v2426_v7  ;;  %v931_v36 = vmax.f32 %v816_v52, 0.0  ;;  %v804_v28 = vadd.f32 %v803_v42, %v2428_v8  ;;  %v925_v52 = vmax.f32 %v800_v61, 0.0 }
 0x230   :  { %v819_v24 = vpop.f32.mrf.mxu1  ;;  %v780_v8 = vadd.f32 %v2476_v19, %v2442_v40  ;;  %v794_v42 = vadd.f32 %v793_v4, %v2432_v9  ;;  %v923_v3 = vmax.f32 %v796_v6, 0.0  ;;  %v784_v4 = vadd.f32 %v2480_v59, %v2436_v11 }
 0x231   :  { %v820_v53 = vadd.f32 %v819_v24, %v2426_v7  ;;  %v932_v55 = vmax.f32 %v818_v43, 0.0  ;;  %v541_v7 = vpop.permute.xlu1 %540  ;;  %v928_v43 = vmax.f32 %v808_v54, 0.0  ;;  %v979_v24 = vpack.c.bf16 %v929_v41, %v927_v27 }
 0x232   :  { %v823_v22 = vpop.f32.mrf.mxu1  ;;  %v977_v19 = vpack.c.bf16 %v925_v52, %v923_v3  ;;  %v922_v61 = vmax.f32 %v794_v42, 0.0  ;;  %v919_v41 = vmax.f32 %v786_v38, 0.0  ;;  %v917_v27 = vmax.f32 %v780_v8, 0.0 }
 0x233   :  { %v933_v49 = vmax.f32 %v820_v53, 0.0  ;;  %v824_v15 = vadd.f32 %v823_v22, %v536_v30  ;;  %v980_v33 = vpack.c.bf16 %v932_v55, %v930_v34  ;;  %v764_v42 = vadd.f32 %v2452_v21, %v2444_v12 }
 0x234   :  { %v825_v32 = vpop.f32.mrf.mxu1  ;;  %v976_v11 = vpack.c.bf16 %v924_v26, %v922_v61 }
 0x235   :  { %v981_v35 = vpack.c.bf16 %v933_v49, %v931_v36  ;;  %v826_v53 = vadd.f32 %v825_v32, %v536_v30  ;;  %v926_v36 = vmax.f32 %v804_v28, 0.0  ;;  %v934_v10 = vmax.f32 %v824_v15, 0.0 }
 0x236   :  { %v827_v51 = vpop.f32.mrf.mxu1  ;;  %v788_v32 = vadd.f32 %v2487_v63, %v2438_v0  ;;  %v921_v30 = vmax.f32 %v790_v37, 0.0  ;;  %v770_v49 = vadd.f32 %v2462_v58, %v2446_v13  ;;  %v778_v28 = vadd.f32 %v2472_v14, %v2442_v40 }
 0x237   :  { %v828_v17 = vadd.f32 %v827_v51, %v541_v7  ;;  %1382 = vmatprep.subr.bf16.mxu0 %v981_v35  ;;  %v978_v54 = vpack.c.bf16 %v928_v43, %v926_v36  ;;  %v935_v22 = vmax.f32 %v826_v53, 0.0  ;;  %v766_v37 = vadd.f32 %v2456_v56, %v2444_v12 }
 0x238   :  { %v829_v46 = vpop.f32.mrf.mxu1  ;;  %1383 = vmatpush1.bf16.msra.mxu0 %v980_v33  ;;  %v920_v6 = vmax.f32 %v788_v32, 0.0  ;;  %v975_v35 = vpack.c.bf16 %v921_v30, %v919_v41  ;;  %v918_v43 = vmax.f32 %v784_v4, 0.0  ;;  %v913_v52 = vmax.f32 %v770_v49, 0.0 }
 0x239   :  { %v936_v31 = vmax.f32 %v828_v17, 0.0  ;;  %v830_v34 = vadd.f32 %v829_v46, %v541_v7  ;;  %1384 = vmatprep.subr.bf16.mxu0 %v979_v24  ;;  %v776_v17 = vadd.f32 %v2470_v2, %v2440_v39  ;;  %v916_v24 = vmax.f32 %v778_v28, 0.0 }
 0x23a   :  { %v833_v55 = vpop.f32.mrf.mxu1  ;;  %v974_v53 = vpack.c.bf16 %v920_v6, %v918_v43  ;;  %v914_v36 = vmax.f32 %v774_v29, 0.0 }
 0x23b   :  { %v2525_v60 = vpack.c.bf16 %v936_v31, %v934_v10  ;;  %v937_v9 = vmax.f32 %v830_v34, 0.0  ;;  %v834_v63 = vadd.f32 %v833_v55, %v2503_v50  ;;  %v915_v33 = vmax.f32 %v776_v17, 0.0 }
 0x23c   :  { %v835_v15 = vpop.f32.mrf.mxu1  ;;  %1385 = vmatpush1.bf16.msra.mxu0 %v978_v54  ;;  %v910_v34 = vmax.f32 %v764_v42, 0.0 }
 0x23d   :  { %v2531_v0 = vpack.c.bf16 %v937_v9, %v935_v22  ;;  %1386 = vmatprep.subr.bf16.mxu0 %v977_v19  ;;  %v836_v7 = vadd.f32 %v835_v15, %v2503_v50  ;;  %v938_v40 = vmax.f32 %v834_v63, 0.0  ;;  %v768_v50 = vadd.f32 %v2460_v18, %v2446_v13 }
 0x23e   :  { %v837_v59 = vpop.f32.mrf.mxu1  ;;  %v973_v56 = vpack.c.bf16 %v917_v27, %v915_v33  ;;  %v972_v18 = vpack.c.bf16 %v916_v24, %v914_v36  ;;  %v2933_v36 = vld [vmem:[#allocation3_spill] sm:$0xff] }
 0x23f   :  { %v838_v2 = vadd.f32 %v837_v59, %v2508_v23  ;;  %v939_v38 = vmax.f32 %v836_v7, 0.0  ;;  %v912_v13 = vmax.f32 %v768_v50, 0.0 }
 0x240   :  { %v839_v58 = vpop.f32.mrf.mxu1  ;;  %1387 = vmatpush1.bf16.msra.mxu0 %v976_v11 }
 0x241   :  { %v940_v14 = vmax.f32 %v838_v2, 0.0  ;;  %v840_v51 = vadd.f32 %v839_v58, %v2508_v23  ;;  %1388 = vmatprep.subr.bf16.mxu0 %v975_v35  ;;  %v911_v23 = vmax.f32 %v766_v37, 0.0  ;;  %v970_v30 = vpack.c.bf16 %v912_v13, %v910_v34 }
 0x242   :  { %v2547_v8 = vpop.f32.mrf.mxu1 }
 0x243   :  { %v2549_v39 = vpack.c.bf16 %v940_v14, %v938_v40  ;;  %v941_v48 = vmax.f32 %v840_v51, 0.0  ;;  %v971_v31 = vpack.c.bf16 %v913_v52, %v911_v23 }
 0x244   :  { %v2553_v46 = vpop.f32.mrf.mxu1  ;;  %1389 = vmatpush1.bf16.msra.mxu0 %v974_v53 }
 0x245   :  { %v2555_v3 = vpack.c.bf16 %v941_v48, %v939_v38  ;;  %1390 = vmatprep.subr.bf16.mxu0 %v973_v56 }
 0x246   :  { %v2557_v10 = vpop.f32.mrf.mxu1 }
 0x248   :  { %v2559_v32 = vpop.f32.mrf.mxu1  ;;  %1391 = vmatpush1.bf16.msra.mxu0 %v972_v18 }
 0x249   :  { %1392 = vmatprep.subr.bf16.mxu0 %v971_v31 }
 0x24a   :  { %v2561_v12 = vpop.f32.mrf.mxu1 }
 0x24c   :  { %v2563_v21 = vpop.f32.mrf.mxu1  ;;  %1393 = vmatpush1.bf16.msra.mxu0 %v970_v30 }
 0x24d   :  { %1394 = vmatprep.subr.bf16.mxu0 %v2458_v57 }
 0x24e   :  { %v2566_v26 = vpop.f32.mrf.mxu1 }
 0x250   :  { %v859_v54 = vpop.f32.mrf.mxu1  ;;  %1395 = vmatpush1.bf16.msra.mxu0 %v2454_v45 }
 0x251   :  { %1396 = vmatprep.subr.bf16.mxu0 %v2450_v25 }
 0x252   :  { %v863_v55 = vpop.f32.mrf.mxu1 }
 0x254   :  { %v865_v19 = vpop.f32.mrf.mxu1  ;;  %1397 = vmatpush1.bf16.msra.mxu0 %v2448_v44 }
 0x256   :  { %v867_v22 = vpop.f32.mrf.mxu1 }
 0x258   :  { %v869_v9 = vpop.f32.mrf.mxu1 }
 0x25a   :  { %v873_v4 = vpop.f32.mrf.mxu1 }
 0x25b   :  { %v874_v48 = vadd.f32 %v873_v4, %v2485_v62 }
 0x25c   :  { %v875_v61 = vpop.f32.mrf.mxu1 }
 0x25d   :  { %v876_v51 = vadd.f32 %v875_v61, %v2485_v62 }
 0x25e   :  { %v877_v15 = vpop.f32.mrf.mxu1 }
 0x25f   :  { %v878_v52 = vadd.f32 %v877_v15, %v2489_v1  ;;  %v955_v23 = vmax.f32 %v876_v51, 0.0  ;;  %v954_v15 = vmax.f32 %v874_v48, 0.0  ;;  %v1895_v51 = vld [vmem:[%s2906_s5 + $0x60] ss:$8 sps:$4 sm:$0xff]   ;;  %v1910_v48 = vld [vmem:[%s2906_s5 + $0xb0] ss:$8 sps:$4 sm:$0xff]  }
 0x260   :  { %v879_v17 = vpop.f32.mrf.mxu1 }
 0x261   :  { %v880_v29 = vadd.f32 %v879_v17, %v2489_v1  ;;  %v956_v18 = vmax.f32 %v878_v52, 0.0  ;;  %v2934_v1 = vld [vmem:[#allocation6_spill] sm:$0xff]  ;;  %v2935_v17 = vld [vmem:[#allocation5_spill] sm:$0xff]  ;;  %v1899_v52 = vld [vmem:[%s2906_s5 + $0x84] ss:$8 sps:$4 sm:$0xff]  }
 0x262   :  { %v883_v41 = vpop.f32.mrf.mxu1  ;;  %v860_v34 = vadd.f32 %v859_v54, %v2934_v1  ;;  %v856_v62 = vadd.f32 %v2563_v21, %v2935_v17 }
 0x263   :  { %v884_v40 = vadd.f32 %v883_v41, %v2474_v16 }
 0x264   :  { %v885_v63 = vpop.f32.mrf.mxu1  ;;  %v949_v54 = vmax.f32 %v860_v34, 0.0  ;;  %v2699_v34 = vpop.permute.xlu0 %1134 }
 0x265   :  { %v886_v35 = vadd.f32 %v885_v63, %v2474_v16  ;;  %v958_v42 = vmax.f32 %v884_v40, 0.0  ;;  %v866_v16 = vadd.f32 %v865_v19, %v2933_v36  ;;  %v858_v19 = vadd.f32 %v2566_v26, %v2934_v1  ;;  %v2936_v63 = vld [vmem:[#allocation8_spill] sm:$0xff]  ;;  %v1892_v40 = vld [vmem:[%s2906_s5 + $0x50] ss:$8 sps:$4 sm:$0xff]  }
 0x266   :  { %v887_v57 = vpop.f32.mrf.mxu1  ;;  %v848_v26 = vadd.f32 %v2557_v10, %v2936_v63  ;;  %v1878_v10 = vld [vmem:[%s2906_s5 + $0x14] ss:$8 sps:$4 sm:$0xff]   ;;  %v1922_v1 = vld [vmem:[%s2906_s5 + $0xf0] ss:$8 sps:$4 sm:$0xff]  }
 0x267   :  { %v888_v2 = vadd.f32 %v887_v57, %v2478_v20  ;;  %v959_v50 = vmax.f32 %v886_v35, 0.0  ;;  %v951_v4 = vmax.f32 %v866_v16, 0.0  ;;  %v850_v57 = vadd.f32 %v2559_v32, %v2936_v63  ;;  %v1914_v16 = vld [vmem:[%s2906_s5 + $0xd4] ss:$8 sps:$4 sm:$0xff]  }
 0x268   :  { %v889_v49 = vpop.f32.mrf.mxu1  ;;  %v944_v35 = vmax.f32 %v848_v26, 0.0 }
 0x269   :  { %v890_v45 = vadd.f32 %v889_v49, %v2478_v20  ;;  %v960_v24 = vmax.f32 %v888_v2, 0.0  ;;  %v957_v20 = vmax.f32 %v880_v29, 0.0  ;;  %v1886_v29 = vld [vmem:[%s2906_s5 + $0x30] ss:$8 sps:$4 sm:$0xff]  }
 0x26a   :  { %v893_v28 = vpop.f32.mrf.mxu1 }
 0x26b   :  { %v894_v44 = vadd.f32 %v893_v28, %v2464_v47  ;;  %v961_v43 = vmax.f32 %v890_v45, 0.0  ;;  %v994_v31 = vpack.c.bf16 %v960_v24, %v958_v42  ;;  %v993_v61 = vpack.c.bf16 %v957_v20, %v955_v23  ;;  %v1901_v24 = vld [vmem:[%s2906_s5 + $0x80] ss:$8 sps:$4 sm:$0xff]   ;;  %v1911_v42 = vld [vmem:[%s2906_s5 + $0xc4] ss:$8 sps:$4 sm:$0xff]  }
 0x26c   :  { %v895_v6 = vpop.f32.mrf.mxu1  ;;  %v948_v45 = vmax.f32 %v858_v19, 0.0  ;;  %v1907_v20 = vld [vmem:[%s2906_s5 + $0xa0] ss:$8 sps:$4 sm:$0xff]   ;;  %v1916_v23 = vld [vmem:[%s2906_s5 + $0xd0] ss:$8 sps:$4 sm:$0xff]  }
 0x26d   :  { %v896_v25 = vadd.f32 %v895_v6, %v2464_v47  ;;  %v962_v14 = vmax.f32 %v894_v44, 0.0  ;;  %v995_v38 = vpack.c.bf16 %v961_v43, %v959_v50  ;;  %v2937_v6 = vld [vmem:[#allocation7_spill] sm:$0xff]  ;;  %v1896_v50 = vld [vmem:[%s2906_s5 + $0x74] ss:$8 sps:$4 sm:$0xff]  }
 0x26e   :  { %v897_v11 = vpop.f32.mrf.mxu1  ;;  %v846_v21 = vadd.f32 %v2553_v46, %v2937_v6  ;;  %v844_v32 = vadd.f32 %v2547_v8, %v2937_v6  ;;  %v1875_v8 = vld [vmem:[%s2906_s5] ss:$8 sps:$4 sm:$0xff]   ;;  %v1887_v43 = vld [vmem:[%s2906_s5 + $0x44] ss:$8 sps:$4 sm:$0xff]  }
 0x26f   :  { %v898_v59 = vadd.f32 %v897_v11, %v2468_v5  ;;  %v963_v58 = vmax.f32 %v896_v25, 0.0  ;;  %v947_v11 = vmax.f32 %v856_v62, 0.0 }
 0x270   :  { %v899_v27 = vpop.f32.mrf.mxu1  ;;  %v942_v46 = vmax.f32 %v844_v32, 0.0 }
 0x271   :  { %v900_v7 = vadd.f32 %v899_v27, %v2468_v5  ;;  %v964_v37 = vmax.f32 %v898_v59, 0.0  ;;  %v2932_v5 = vld [vmem:[#allocation4_spill] sm:$0xff]  ;;  %v945_v59 = vmax.f32 %v850_v57, 0.0  ;;  %v989_v44 = vpack.c.bf16 %v949_v54, %v947_v11 }
 0x272   :  { %v870_v56 = vadd.f32 %v869_v9, %v2932_v5  ;;  %v868_v13 = vadd.f32 %v867_v22, %v2932_v5  ;;  %v864_v9 = vadd.f32 %v863_v55, %v2933_v36  ;;  %v992_v22 = vpack.c.bf16 %v956_v18, %v954_v15  ;;  %v1904_v5 = vld [vmem:[%s2906_s5 + $0x90] ss:$8 sps:$4 sm:$0xff]   ;;  %v1913_v36 = vld [vmem:[%s2906_s5 + $0xc0] ss:$8 sps:$4 sm:$0xff]  }
 0x273   :  { %v965_v33 = vmax.f32 %v900_v7, 0.0  ;;  %v996_v53 = vpack.c.bf16 %v964_v37, %v962_v14  ;;  %v854_v55 = vadd.f32 %v2561_v12, %v2935_v17  ;;  %v943_v12 = vmax.f32 %v846_v21, 0.0  ;;  %v1893_v14 = vld [vmem:[%s2906_s5 + $0x64] ss:$8 sps:$4 sm:$0xff]   ;;  %v1919_v18 = vld [vmem:[%s2906_s5 + $0xe0] ss:$8 sps:$4 sm:$0xff]  }
 0x274   :  { %v953_v30 = vmax.f32 %v870_v56, 0.0  ;;  %v952_v41 = vmax.f32 %v868_v13, 0.0  ;;  %v950_v28 = vmax.f32 %v864_v9, 0.0  ;;  %v986_v37 = vpack.c.bf16 %v944_v35, %v942_v46  ;;  %v1905_v56 = vld [vmem:[%s2906_s5 + $0xa4] ss:$8 sps:$4 sm:$0xff]  }
 0x275   :  { %v997_v47 = vpack.c.bf16 %v965_v33, %v963_v58  ;;  %v946_v27 = vmax.f32 %v854_v55, 0.0  ;;  %v987_v2 = vpack.c.bf16 %v945_v59, %v943_v12  ;;  %v1889_v58 = vld [vmem:[%s2906_s5 + $0x40] ss:$8 sps:$4 sm:$0xff]   ;;  %v1890_v33 = vld [vmem:[%s2906_s5 + $0x54] ss:$8 sps:$4 sm:$0xff]  }
 0x276   :  { %v991_v49 = vpack.c.bf16 %v953_v30, %v951_v4  ;;  %v990_v25 = vpack.c.bf16 %v952_v41, %v950_v28  ;;  %v1917_v13 = vld [vmem:[%s2906_s5 + $0xe4] ss:$8 sps:$4 sm:$0xff]   ;;  %v2701_v30 = vpop.permute.xlu1 %1139 }
 0x277   :  { %1398 = vmatprep.subr.bf16.mxu0 %v997_v47  ;;  %v988_v7 = vpack.c.bf16 %v948_v45, %v946_v27  ;;  %v1898_v47 = vld [vmem:[%s2906_s5 + $0x70] ss:$8 sps:$4 sm:$0xff]  }
 0x278   :  { %1399 = vmatpush2.bf16.msra.mxu0 %v996_v53  ;;  %v1902_v53 = vld [vmem:[%s2906_s5 + $0x94] ss:$8 sps:$4 sm:$0xff]  }
 0x279   :  { %1400 = vmatprep.subr.bf16.mxu0 %v995_v38  ;;  %v1908_v38 = vld [vmem:[%s2906_s5 + $0xb4] ss:$8 sps:$4 sm:$0xff]  }
 0x27a   :  { %v2705_v9 = vpop.permute.xlu1 %1129 }
 0x27c   :  { %1401 = vmatpush2.bf16.msra.mxu0 %v994_v31  ;;  %v1920_v31 = vld [vmem:[%s2906_s5 + $0xf4] ss:$8 sps:$4 sm:$0xff]  }
 0x27d   :  { %1402 = vmatprep.subr.bf16.mxu0 %v993_v61  ;;  %v2703_v61 = vpop.permute.xlu0 %1124 }
 0x27e   :  { %v2709_v17 = vpop.permute.xlu1 %1119 }
 0x280   :  { %1403 = vmatpush2.bf16.msra.mxu0 %v992_v22 }
 0x281   :  { %1404 = vmatprep.subr.bf16.mxu0 %v991_v49  ;;  %v2707_v15 = vpop.permute.xlu0 %1114 }
 0x282   :  { %v2713_v4 = vpop.permute.xlu1 %1109 }
 0x284   :  { %1405 = vmatpush2.bf16.msra.mxu0 %v990_v25 }
 0x285   :  { %1406 = vmatprep.subr.bf16.mxu0 %v989_v44  ;;  %v2711_v62 = vpop.permute.xlu0 %1104 }
 0x286   :  { %v2717_v41 = vpop.permute.xlu1 %1099 }
 0x288   :  { %1407 = vmatpush2.bf16.msra.mxu0 %v988_v7 }
 0x289   :  { %1408 = vmatprep.subr.bf16.mxu0 %v987_v2  ;;  %v2715_v19 = vpop.permute.xlu0 %1094 }
 0x28a   :  { %v2721_v63 = vpop.permute.xlu1 %1089 }
 0x28c   :  { %1409 = vmatpush2.bf16.msra.mxu0 %v986_v37 }
 0x28d   :  { %1410 = vmatprep.subr.bf16.mxu0 %v2555_v3  ;;  %v1880_v3 = vld [vmem:[%s2906_s5 + $0x10] ss:$8 sps:$4 sm:$0xff]   ;;  %v2719_v22 = vpop.permute.xlu0 %1084 }
 0x28e   :  { %v1080_v54 = vpop.permute.xlu1 %1079 }
 0x290   :  { %1411 = vmatpush2.bf16.msra.mxu0 %v2549_v39  ;;  %v1884_v39 = vld [vmem:[%s2906_s5 + $0x34] ss:$8 sps:$4 sm:$0xff]  }
 0x291   :  { %1412 = vmatprep.subr.bf16.mxu0 %v2531_v0  ;;  %v1881_v0 = vld [vmem:[%s2906_s5 + $0x24] ss:$8 sps:$4 sm:$0xff]   ;;  %v1075_v57 = vpop.permute.xlu0 %1074 }
 0x292   :  { %v1070_v21 = vpop.permute.xlu1 %1069 }
 0x294   :  { %1413 = vmatpush2.bf16.msra.mxu0 %v2525_v60  ;;  %v1883_v60 = vld [vmem:[%s2906_s5 + $0x20] ss:$8 sps:$4 sm:$0xff]  }
 0x295   :  { %v1065_v55 = vpop.permute.xlu0 %1064 }
 0x297   :  { %1415 = vmatmul.mubr.bf16.vlgmr.msra.gmra.mxu0 %v1875_v8 }
 0x298   :  { %1424 = vmatprep.mubr.bf16.mxu0 %v1878_v10 }
 0x29f   :  { %1425 = vmatmul.mubr.bf16.gmra.mxu0 %v1880_v3 }
 0x2a0   :  { %1434 = vmatprep.mubr.bf16.mxu0 %v1881_v0 }
 0x2a7   :  { %1435 = vmatmul.mubr.bf16.gmra.mxu0 %v1883_v60 }
 0x2a8   :  { %1444 = vmatprep.mubr.bf16.mxu0 %v1884_v39 }
 0x2af   :  { %1445 = vmatmul.mubr.bf16.gmra.mxu0 %v1886_v29 }
 0x2b0   :  { %1454 = vmatprep.mubr.bf16.mxu0 %v1887_v43 }
 0x2b7   :  { %1455 = vmatmul.mubr.bf16.gmra.mxu0 %v1889_v58 }
 0x2b8   :  { %1464 = vmatprep.mubr.bf16.mxu0 %v1890_v33 }
 0x2bf   :  { %1465 = vmatmul.mubr.bf16.gmra.mxu0 %v1892_v40 }
 0x2c0   :  { %1474 = vmatprep.mubr.bf16.mxu0 %v1893_v14 }
 0x2c7   :  { %1475 = vmatmul.mubr.bf16.gmra.mxu0 %v1895_v51 }
 0x2c8   :  { %1484 = vmatprep.mubr.bf16.mxu0 %v1896_v50 }
 0x2cf   :  { %1485 = vmatmul.mubr.bf16.gmra.mxu0 %v1898_v47 }
 0x2d0   :  { %1494 = vmatprep.mubr.bf16.mxu0 %v1899_v52  ;;  %v2739_v52 = vpop.permute.xlu0 %1214 }
 0x2d7   :  { %1495 = vmatmul.mubr.bf16.gmra.mxu0 %v1901_v24 }
 0x2d8   :  { %1504 = vmatprep.mubr.bf16.mxu0 %v1902_v53  ;;  %v2743_v53 = vpop.permute.xlu1 %1219 }
 0x2df   :  { %1505 = vmatmul.mubr.bf16.gmra.mxu0 %v1904_v5 }
 0x2e0   :  { %1514 = vmatprep.mubr.bf16.mxu0 %v1905_v56 }
 0x2e7   :  { %1515 = vmatmul.mubr.bf16.gmra.mxu0 %v1907_v20  ;;  %v1932_v20 = vmov 1966171168  }
 0x2e8   :  { %1524 = vmatprep.mubr.bf16.mxu0 %v1908_v38  ;;  %v1684_v38 = vunpack.c.l.s4 %v1932_v20 }
 0x2ef   :  { %1525 = vmatmul.mubr.bf16.gmra.mxu0 %v1910_v48  ;;  %v2916_v48 = vlaneseq }
 0x2f0   :  { %1534 = vmatprep.mubr.bf16.mxu0 %v1911_v42  ;;  %v2749_v42 = vpop.permute.xlu0 %1204 }
 0x2f7   :  { %1535 = vmatmul.mubr.bf16.gmra.mxu0 %v1913_v36 }
 0x2f8   :  { %1544 = vmatprep.mubr.bf16.mxu0 %v1914_v16  ;;  %v1685_v16 = vunpack.c.0.s8 %v1684_v38 }
 0x2ff   :  { %1545 = vmatmul.mubr.bf16.gmra.mxu0 %v1916_v23  ;;  %v1687_v23 = vshrl.u32 %v2916_v48, 7 }
 0x300   :  { %1554 = vmatprep.mubr.bf16.mxu0 %v1917_v13  ;;  %v2757_v13 = vld.sshfl [vmem:[%s2907_s7] sm:$0x11 pattern:$0x75316420] }
 0x301   :  { %2938 = vst [vmem:[#allocation4_spill] sm:$0xff] %v2757_v13 }
 0x307   :  { %1555 = vmatmul.mubr.bf16.gmra.mxu0 %v1919_v18  ;;  %v2759_v18 = vpop.permute.xlu1 %1209 }
 0x308   :  { %1564 = vmatprep.mubr.bf16.mxu0 %v1920_v31 }
 0x30f   :  { %1565 = vmatmul.mubr.bf16.gmra.mxu0 %v1922_v1  ;;  %v1682_v1 = vcombine.high %v2757_v13, %v2757_v13 }
 0x357   :  { %v1416_v49 = vpop.f32.mrf.mxu0 }
 0x358   :  { %v1417_v6 = vadd.f32 %v1416_v49, %v1065_v55 }
 0x359   :  { %v1418_v28 = vpop.f32.mrf.mxu0 }
 0x35a   :  { %v1419_v26 = vadd.f32 %v1418_v28, %v1065_v55  ;;  %v1575_v59 = vmax.f32 %v1417_v6, 0.0  ;;  %v2768_v55 = vpop.permute.xlu0 %1194  ;;  %v2772_v6 = vpop.permute.xlu1 %1199 }
 0x35b   :  { %v1420_v11 = vpop.f32.mrf.mxu0 }
 0x35c   :  { %v1421_v45 = vadd.f32 %v1420_v11, %v1070_v21  ;;  %v1576_v12 = vmax.f32 %v1419_v26, 0.0 }
 0x35d   :  { %v1422_v25 = vpop.f32.mrf.mxu0 }
 0x35e   :  { %v1577_v44 = vmax.f32 %v1421_v45, 0.0  ;;  %v1423_v32 = vadd.f32 %v1422_v25, %v1070_v21  ;;  %v2774_v26 = vpop.permute.xlu0 %1184  ;;  %v2776_v25 = vpop.permute.xlu1 %1189 }
 0x35f   :  { %v1426_v27 = vpop.f32.mrf.mxu0  ;;  %2940 = vst [vmem:[#allocation6_spill] sm:$0xff] %v2774_v26  ;;  %2941 = vst [vmem:[#allocation5_spill] sm:$0xff] %v2776_v25 }
 0x360   :  { %v2723_v35 = vpack.c.bf16 %v1577_v44, %v1575_v59  ;;  %v1578_v7 = vmax.f32 %v1423_v32, 0.0  ;;  %v1427_v37 = vadd.f32 %v1426_v27, %v1075_v57 }
 0x361   :  { %v1428_v2 = vpop.f32.mrf.mxu0 }
 0x362   :  { %v2725_v46 = vpack.c.bf16 %v1578_v7, %v1576_v12  ;;  %v1429_v10 = vadd.f32 %v1428_v2, %v1075_v57  ;;  %v1579_v60 = vmax.f32 %v1427_v37, 0.0  ;;  %v2765_v57 = vsub.s32 %v1685_v16, %v1687_v23  ;;  %v2778_v32 = vpop.permute.xlu0 %1174  ;;  %v2780_v12 = vpop.permute.xlu1 %1179 }
 0x363   :  { %v1430_v8 = vpop.f32.mrf.mxu0  ;;  %2942 = vst [vmem:[#allocation8_spill] sm:$0xff] %v2778_v32  ;;  %2943 = vst [vmem:[#allocation7_spill] sm:$0xff] %v2780_v12 }
 0x364   :  { %v1431_v3 = vadd.f32 %v1430_v8, %v1080_v54  ;;  %v1580_v58 = vmax.f32 %v1429_v10, 0.0  ;;  %2939 = vst [vmem:[#allocation3_spill] sm:$0xff] %v2765_v57  ;;  %v1696_v49 = vrot.slane %v1682_v1, %v2765_v57 }
 0x365   :  { %v1432_v0 = vpop.f32.mrf.mxu0 }
 0x366   :  { %v1581_v39 = vmax.f32 %v1431_v3, 0.0  ;;  %v1433_v29 = vadd.f32 %v1432_v0, %v1080_v54  ;;  %1731 = vmatprep.mubr.bf16.mxu1 %v1696_v49  ;;  %v2782_v37 = vpop.permute.xlu0 %1164  ;;  %v2784_v10 = vpop.permute.xlu1 %1169 }
 0x367   :  { %v2727_v43 = vpop.f32.mrf.mxu0  ;;  %2944 = vst [vmem:[#allocation9_spill] sm:$0xff] %v2782_v37  ;;  %2945 = vst [vmem:[#allocation10_spill] sm:$0xff] %v2784_v10 }
 0x368   :  { %v2729_v33 = vpack.c.bf16 %v1581_v39, %v1579_v60  ;;  %v1582_v40 = vmax.f32 %v1433_v29, 0.0 }
 0x369   :  { %v2731_v14 = vpop.f32.mrf.mxu0 }
 0x36a   :  { %v2733_v51 = vpack.c.bf16 %v1582_v40, %v1580_v58  ;;  %v2786_v60 = vpop.permute.xlu0 %1154  ;;  %v2791_v20 = vpop.permute.xlu1 %1159 }
 0x36b   :  { %v2735_v50 = vpop.f32.mrf.mxu0 }
 0x36d   :  { %v2737_v47 = vpop.f32.mrf.mxu0 }
 0x36e   :  { %v1145_v10 = vpop.permute.xlu0 %1144 }
 0x36f   :  { %v2741_v24 = vpop.f32.mrf.mxu0 }
 0x371   :  { %v2745_v5 = vpop.f32.mrf.mxu0 }
 0x373   :  { %v2747_v56 = vpop.f32.mrf.mxu0 }
 0x375   :  { %v2751_v36 = vpop.f32.mrf.mxu0 }
 0x377   :  { %v2761_v31 = vpop.f32.mrf.mxu0 }
 0x379   :  { %v1458_v54 = vpop.f32.mrf.mxu0 }
 0x37b   :  { %v2770_v28 = vpop.f32.mrf.mxu0 }
 0x37d   :  { %v1462_v21 = vpop.f32.mrf.mxu0 }
 0x37f   :  { %v1466_v11 = vpop.f32.mrf.mxu0 }
 0x381   :  { %v1468_v45 = vpop.f32.mrf.mxu0 }
 0x383   :  { %v1470_v59 = vpop.f32.mrf.mxu0 }
 0x385   :  { %v1472_v44 = vpop.f32.mrf.mxu0 }
 0x386   :  { %v1473_v57 = vadd.f32 %v1472_v44, %v2709_v17 }
 0x387   :  { %v1476_v27 = vpop.f32.mrf.mxu0 }
 0x389   :  { %v1478_v7 = vpop.f32.mrf.mxu0 }
 0x38a   :  { %v1479_v23 = vadd.f32 %v1478_v7, %v2703_v61 }
 0x38b   :  { %v1480_v2 = vpop.f32.mrf.mxu0 }
 0x38c   :  { %v1481_v49 = vadd.f32 %v1480_v2, %v2705_v9  ;;  %v1471_v2 = vadd.f32 %v1470_v59, %v2709_v17 }
 0x38d   :  { %v1482_v8 = vpop.f32.mrf.mxu0 }
 0x38e   :  { %v1483_v29 = vadd.f32 %v1482_v8, %v2705_v9  ;;  %v1463_v9 = vadd.f32 %v1462_v21, %v2713_v4 }
 0x38f   :  { %v1486_v3 = vpop.f32.mrf.mxu0 }
 0x390   :  { %v1487_v38 = vadd.f32 %v1486_v3, %v2699_v34  ;;  %v1602_v8 = vmax.f32 %v1483_v29, 0.0  ;;  %v1600_v3 = vmax.f32 %v1479_v23, 0.0 }
 0x391   :  { %v1488_v0 = vpop.f32.mrf.mxu0 }
 0x392   :  { %v1489_v58 = vadd.f32 %v1488_v0, %v2699_v34  ;;  %v1603_v32 = vmax.f32 %v1487_v38, 0.0  ;;  %v1469_v34 = vadd.f32 %v1468_v45, %v2707_v15  ;;  %v1459_v45 = vadd.f32 %v1458_v54, %v2711_v62 }
 0x393   :  { %v1490_v39 = vpop.f32.mrf.mxu0 }
 0x394   :  { %v1491_v40 = vadd.f32 %v1490_v39, %v2701_v30  ;;  %v1604_v37 = vmax.f32 %v1489_v58, 0.0  ;;  %v1477_v39 = vadd.f32 %v1476_v27, %v2703_v61  ;;  %v1598_v58 = vmax.f32 %v1473_v57, 0.0 }
 0x395   :  { %v1492_v16 = vpop.f32.mrf.mxu0  ;;  %v1453_v61 = vadd.f32 %v2751_v36, %v2717_v41  ;;  %v1596_v21 = vmax.f32 %v1469_v34, 0.0  ;;  %v1461_v57 = vadd.f32 %v2770_v28, %v2713_v4 }
 0x396   :  { %v1493_v1 = vadd.f32 %v1492_v16, %v2701_v30  ;;  %v1605_v48 = vmax.f32 %v1491_v40, 0.0  ;;  %v1150_v30 = vpop.permute.xlu1 %1149  ;;  %v1601_v40 = vmax.f32 %v1481_v49, 0.0  ;;  %v1652_v16 = vpack.c.bf16 %v1602_v8, %v1600_v3 }
 0x397   :  { %v1496_v13 = vpop.f32.mrf.mxu0  ;;  %v1599_v27 = vmax.f32 %v1477_v39, 0.0  ;;  %v1650_v36 = vpack.c.bf16 %v1598_v58, %v1596_v21  ;;  %v1592_v8 = vmax.f32 %v1459_v45, 0.0  ;;  %v1451_v39 = vadd.f32 %v2747_v56, %v2717_v41 }
 0x398   :  { %v1606_v0 = vmax.f32 %v1493_v1, 0.0  ;;  %v1497_v26 = vadd.f32 %v1496_v13, %v1145_v10  ;;  %v1653_v44 = vpack.c.bf16 %v1605_v48, %v1603_v32  ;;  %v1467_v13 = vadd.f32 %v1466_v11, %v2707_v15 }
 0x399   :  { %v1498_v12 = vpop.f32.mrf.mxu0  ;;  %v1594_v32 = vmax.f32 %v1463_v9, 0.0  ;;  %v1457_v11 = vadd.f32 %v2761_v31, %v2711_v62  ;;  %v1593_v34 = vmax.f32 %v1461_v57, 0.0  ;;  %v1590_v3 = vmax.f32 %v1453_v61, 0.0 }
 0x39a   :  { %v1654_v7 = vpack.c.bf16 %v1606_v0, %v1604_v37  ;;  %v1499_v1 = vadd.f32 %v1498_v12, %v1145_v10  ;;  %v1607_v17 = vmax.f32 %v1497_v26, 0.0  ;;  %v1597_v12 = vmax.f32 %v1471_v2, 0.0 }
 0x39b   :  { %v1500_v29 = vpop.f32.mrf.mxu0  ;;  %v1651_v10 = vpack.c.bf16 %v1601_v40, %v1599_v27  ;;  %v1595_v49 = vmax.f32 %v1467_v13, 0.0  ;;  %v1443_v0 = vadd.f32 %v2737_v47, %v2721_v63  ;;  %v1439_v9 = vadd.f32 %v2731_v14, %v2719_v22 }
 0x39c   :  { %v1501_v25 = vadd.f32 %v1500_v29, %v1150_v30  ;;  %1699 = vmatprep.subr.bf16.mxu1 %v1654_v7  ;;  %v1608_v23 = vmax.f32 %v1499_v1, 0.0  ;;  %v1648_v7 = vpack.c.bf16 %v1594_v32, %v1592_v8  ;;  %v1447_v2 = vadd.f32 %v2741_v24, %v2715_v19 }
 0x39d   :  { %v1502_v37 = vpop.f32.mrf.mxu0  ;;  %1700 = vmatpush1.bf16.msra.mxu1 %v1653_v44  ;;  %v1649_v62 = vpack.c.bf16 %v1597_v12, %v1595_v49  ;;  %v1591_v40 = vmax.f32 %v1457_v11, 0.0  ;;  %v1586_v58 = vmax.f32 %v1443_v0, 0.0  ;;  %v1437_v13 = vadd.f32 %v2727_v43, %v2719_v22 }
 0x39e   :  { %v1609_v59 = vmax.f32 %v1501_v25, 0.0  ;;  %v1503_v48 = vadd.f32 %v1502_v37, %v1150_v30  ;;  %1701 = vmatprep.subr.bf16.mxu1 %v1652_v16  ;;  %v1449_v25 = vadd.f32 %v2745_v5, %v2715_v19  ;;  %v1589_v16 = vmax.f32 %v1451_v39, 0.0 }
 0x39f   :  { %v1506_v38 = vpop.f32.mrf.mxu0  ;;  %v1647_v1 = vpack.c.bf16 %v1593_v34, %v1591_v40  ;;  %v1587_v27 = vmax.f32 %v1447_v2, 0.0 }
 0x3a0   :  { %v2808_v54 = vpack.c.bf16 %v1609_v59, %v1607_v17  ;;  %v1610_v15 = vmax.f32 %v1503_v48, 0.0  ;;  %v1507_v28 = vadd.f32 %v1506_v38, %v2786_v60  ;;  %v1588_v44 = vmax.f32 %v1449_v25, 0.0 }
 0x3a1   :  { %v1508_v26 = vpop.f32.mrf.mxu0  ;;  %1702 = vmatpush1.bf16.msra.mxu1 %v1651_v10  ;;  %v1583_v48 = vmax.f32 %v1437_v13, 0.0 }
 0x3a2   :  { %v2814_v4 = vpack.c.bf16 %v1610_v15, %v1608_v23  ;;  %1703 = vmatprep.subr.bf16.mxu1 %v1650_v36  ;;  %v1509_v30 = vadd.f32 %v1508_v26, %v2786_v60  ;;  %v1611_v41 = vmax.f32 %v1507_v28, 0.0  ;;  %v1441_v60 = vadd.f32 %v2735_v50, %v2721_v63 }
 0x3a3   :  { %v1510_v31 = vpop.f32.mrf.mxu0  ;;  %v1646_v14 = vpack.c.bf16 %v1590_v3, %v1588_v44  ;;  %v1645_v50 = vpack.c.bf16 %v1589_v16, %v1587_v27  ;;  %v2947_v27 = vld [vmem:[#allocation6_spill] sm:$0xff] }
 0x3a4   :  { %v1511_v5 = vadd.f32 %v1510_v31, %v2791_v20  ;;  %v1612_v45 = vmax.f32 %v1509_v30, 0.0  ;;  %v1585_v63 = vmax.f32 %v1441_v60, 0.0 }
 0x3a5   :  { %v1512_v47 = vpop.f32.mrf.mxu0  ;;  %1704 = vmatpush1.bf16.msra.mxu1 %v1649_v62 }
 0x3a6   :  { %v1613_v56 = vmax.f32 %v1511_v5, 0.0  ;;  %v1513_v29 = vadd.f32 %v1512_v47, %v2791_v20  ;;  %1705 = vmatprep.subr.bf16.mxu1 %v1648_v7  ;;  %v1584_v20 = vmax.f32 %v1439_v9, 0.0  ;;  %v1643_v32 = vpack.c.bf16 %v1585_v63, %v1583_v48 }
 0x3a7   :  { %v2830_v61 = vpop.f32.mrf.mxu0 }
 0x3a8   :  { %v2832_v19 = vpack.c.bf16 %v1613_v56, %v1611_v41  ;;  %v1614_v24 = vmax.f32 %v1513_v29, 0.0  ;;  %v1644_v59 = vpack.c.bf16 %v1586_v58, %v1584_v20 }
 0x3a9   :  { %v2836_v37 = vpop.f32.mrf.mxu0  ;;  %1706 = vmatpush1.bf16.msra.mxu1 %v1647_v1 }
 0x3aa   :  { %v2838_v21 = vpack.c.bf16 %v1614_v24, %v1612_v45  ;;  %1707 = vmatprep.subr.bf16.mxu1 %v1646_v14 }
 0x3ab   :  { %v2840_v17 = vpop.f32.mrf.mxu0 }
 0x3ad   :  { %v2842_v57 = vpop.f32.mrf.mxu0  ;;  %1708 = vmatpush1.bf16.msra.mxu1 %v1645_v50 }
 0x3ae   :  { %1709 = vmatprep.subr.bf16.mxu1 %v1644_v59 }
 0x3af   :  { %v2844_v22 = vpop.f32.mrf.mxu0 }
 0x3b1   :  { %v2846_v43 = vpop.f32.mrf.mxu0  ;;  %1710 = vmatpush1.bf16.msra.mxu1 %v1643_v32 }
 0x3b2   :  { %1711 = vmatprep.subr.bf16.mxu1 %v2733_v51 }
 0x3b3   :  { %v2849_v12 = vpop.f32.mrf.mxu0 }
 0x3b5   :  { %v1532_v10 = vpop.f32.mrf.mxu0  ;;  %1712 = vmatpush1.bf16.msra.mxu1 %v2729_v33 }
 0x3b6   :  { %1713 = vmatprep.subr.bf16.mxu1 %v2725_v46 }
 0x3b7   :  { %v1536_v38 = vpop.f32.mrf.mxu0 }
 0x3b9   :  { %v1538_v36 = vpop.f32.mrf.mxu0  ;;  %1714 = vmatpush1.bf16.msra.mxu1 %v2723_v35 }
 0x3bb   :  { %v1540_v23 = vpop.f32.mrf.mxu0 }
 0x3bd   :  { %v1542_v15 = vpop.f32.mrf.mxu0 }
 0x3bf   :  { %v1546_v11 = vpop.f32.mrf.mxu0 }
 0x3c0   :  { %v1547_v24 = vadd.f32 %v1546_v11, %v2768_v55 }
 0x3c1   :  { %v1548_v49 = vpop.f32.mrf.mxu0 }
 0x3c2   :  { %v1549_v29 = vadd.f32 %v1548_v49, %v2768_v55 }
 0x3c3   :  { %v1550_v26 = vpop.f32.mrf.mxu0 }
 0x3c4   :  { %v1551_v58 = vadd.f32 %v1550_v26, %v2772_v6  ;;  %v1628_v20 = vmax.f32 %v1549_v29, 0.0  ;;  %v1627_v26 = vmax.f32 %v1547_v24, 0.0 }
 0x3c5   :  { %v1552_v25 = vpop.f32.mrf.mxu0 }
 0x3c6   :  { %v1553_v2 = vadd.f32 %v1552_v25, %v2772_v6  ;;  %v1629_v50 = vmax.f32 %v1551_v58, 0.0  ;;  %v2948_v6 = vld [vmem:[#allocation7_spill] sm:$0xff]  ;;  %v2949_v25 = vld [vmem:[#allocation8_spill] sm:$0xff] }
 0x3c7   :  { %v1556_v8 = vpop.f32.mrf.mxu0  ;;  %v1533_v48 = vadd.f32 %v1532_v10, %v2948_v6  ;;  %v1529_v55 = vadd.f32 %v2846_v43, %v2949_v25 }
 0x3c8   :  { %v1557_v41 = vadd.f32 %v1556_v8, %v2749_v42 }
 0x3c9   :  { %v1558_v28 = vpop.f32.mrf.mxu0  ;;  %v1622_v10 = vmax.f32 %v1533_v48, 0.0 }
 0x3ca   :  { %v1559_v7 = vadd.f32 %v1558_v28, %v2749_v42  ;;  %v1631_v13 = vmax.f32 %v1557_v41, 0.0  ;;  %v1539_v42 = vadd.f32 %v1538_v36, %v2947_v27  ;;  %v1531_v36 = vadd.f32 %v2849_v12, %v2948_v6  ;;  %v2950_v28 = vld [vmem:[#allocation10_spill] sm:$0xff] }
 0x3cb   :  { %v1560_v51 = vpop.f32.mrf.mxu0  ;;  %v1521_v12 = vadd.f32 %v2840_v17, %v2950_v28  ;;  %v2952_v17 = vld [vmem:[#allocation3_spill] sm:$0xff] }
 0x3cc   :  { %v1561_v5 = vadd.f32 %v1560_v51, %v2759_v18  ;;  %v1632_v60 = vmax.f32 %v1559_v7, 0.0  ;;  %v1624_v11 = vmax.f32 %v1539_v42, 0.0  ;;  %v1523_v51 = vadd.f32 %v2842_v57, %v2950_v28 }
 0x3cd   :  { %v1562_v0 = vpop.f32.mrf.mxu0  ;;  %v1617_v7 = vmax.f32 %v1521_v12, 0.0 }
 0x3ce   :  { %v1563_v33 = vadd.f32 %v1562_v0, %v2759_v18  ;;  %v1633_v16 = vmax.f32 %v1561_v5, 0.0  ;;  %v1630_v18 = vmax.f32 %v1553_v2, 0.0 }
 0x3cf   :  { %v1566_v39 = vpop.f32.mrf.mxu0 }
 0x3d0   :  { %v1567_v35 = vadd.f32 %v1566_v39, %v2739_v52  ;;  %v1634_v40 = vmax.f32 %v1563_v33, 0.0  ;;  %v1667_v59 = vpack.c.bf16 %v1633_v16, %v1631_v13  ;;  %v1666_v49 = vpack.c.bf16 %v1630_v18, %v1628_v20 }
 0x3d1   :  { %v1568_v34 = vpop.f32.mrf.mxu0  ;;  %v1621_v33 = vmax.f32 %v1531_v36, 0.0  ;;  %v2954_v18 = vlaneseq }
 0x3d2   :  { %v1569_v46 = vadd.f32 %v1568_v34, %v2739_v52  ;;  %v1635_v56 = vmax.f32 %v1567_v35, 0.0  ;;  %v1668_v45 = vpack.c.bf16 %v1634_v40, %v1632_v60  ;;  %v2951_v34 = vld [vmem:[#allocation9_spill] sm:$0xff]  ;;  %v1673_v40 = vstv %s2908_s8 }
 0x3d3   :  { %v1570_v62 = vpop.f32.mrf.mxu0  ;;  %v1519_v43 = vadd.f32 %v2836_v37, %v2951_v34  ;;  %v1517_v57 = vadd.f32 %v2830_v61, %v2951_v34  ;;  %v2953_v61 = vld [vmem:[#allocation4_spill] sm:$0xff]  ;;  %vm1772_vm2 = vcmp.lt.s32.totalorder %v2954_v18, 256 }
 0x3d4   :  { %v1571_v31 = vadd.f32 %v1570_v62, %v2743_v53  ;;  %v1636_v47 = vmax.f32 %v1569_v46, 0.0  ;;  %v1620_v62 = vmax.f32 %v1529_v55, 0.0  ;;  %v1689_v2 = vrot.slane %v2953_v61, %v2952_v17 }
 0x3d5   :  { %v1572_v3 = vpop.f32.mrf.mxu0  ;;  %v1615_v37 = vmax.f32 %v1517_v57, 0.0 }
 0x3d6   :  { %v1573_v30 = vadd.f32 %v1572_v3, %v2743_v53  ;;  %v1637_v9 = vmax.f32 %v1571_v31, 0.0  ;;  %v2946_v53 = vld [vmem:[#allocation5_spill] sm:$0xff]  ;;  %v1618_v31 = vmax.f32 %v1523_v51, 0.0  ;;  %v1662_v35 = vpack.c.bf16 %v1622_v10, %v1620_v62 }
 0x3d7   :  { %v1543_v14 = vadd.f32 %v1542_v15, %v2946_v53  ;;  %v1541_v63 = vadd.f32 %v1540_v23, %v2946_v53  ;;  %v1537_v15 = vadd.f32 %v1536_v38, %v2947_v27  ;;  %v1665_v23 = vpack.c.bf16 %v1629_v50, %v1627_v26 }
 0x3d8   :  { %v1638_v44 = vmax.f32 %v1573_v30, 0.0  ;;  %v1669_v1 = vpack.c.bf16 %v1637_v9, %v1635_v56  ;;  %v1527_v38 = vadd.f32 %v2844_v22, %v2949_v25  ;;  %v1616_v22 = vmax.f32 %v1519_v43, 0.0 }
 0x3d9   :  { %v1626_v32 = vmax.f32 %v1543_v14, 0.0  ;;  %v1625_v8 = vmax.f32 %v1541_v63, 0.0  ;;  %v1623_v39 = vmax.f32 %v1537_v15, 0.0  ;;  %v1659_v9 = vpack.c.bf16 %v1617_v7, %v1615_v37 }
 0x3da   :  { %v1670_v52 = vpack.c.bf16 %v1638_v44, %v1636_v47  ;;  %v1619_v3 = vmax.f32 %v1527_v38, 0.0  ;;  %v1660_v5 = vpack.c.bf16 %v1618_v31, %v1616_v22 }
 0x3db   :  { %v1664_v0 = vpack.c.bf16 %v1626_v32, %v1624_v11  ;;  %v1663_v46 = vpack.c.bf16 %v1625_v8, %v1623_v39 }
 0x3dc   :  { %1715 = vmatprep.subr.bf16.mxu1 %v1670_v52  ;;  %v1661_v30 = vpack.c.bf16 %v1621_v33, %v1619_v3 }
 0x3dd   :  { %1716 = vmatpush2.bf16.msra.mxu1 %v1669_v1 }
 0x3de   :  { %1717 = vmatprep.subr.bf16.mxu1 %v1668_v45 }
 0x3e1   :  { %1718 = vmatpush2.bf16.msra.mxu1 %v1667_v59 }
 0x3e2   :  { %1719 = vmatprep.subr.bf16.mxu1 %v1666_v49 }
 0x3e5   :  { %1720 = vmatpush2.bf16.msra.mxu1 %v1665_v23 }
 0x3e6   :  { %1721 = vmatprep.subr.bf16.mxu1 %v1664_v0 }
 0x3e9   :  { %1722 = vmatpush2.bf16.msra.mxu1 %v1663_v46 }
 0x3ea   :  { %1723 = vmatprep.subr.bf16.mxu1 %v1662_v35 }
 0x3ed   :  { %1724 = vmatpush2.bf16.msra.mxu1 %v1661_v30 }
 0x3ee   :  { %1725 = vmatprep.subr.bf16.mxu1 %v1660_v5 }
 0x3f1   :  { %1726 = vmatpush2.bf16.msra.mxu1 %v1659_v9 }
 0x3f2   :  { %1727 = vmatprep.subr.bf16.mxu1 %v2838_v21 }
 0x3f5   :  { %1728 = vmatpush2.bf16.msra.mxu1 %v2832_v19 }
 0x3f6   :  { %1729 = vmatprep.subr.bf16.mxu1 %v2814_v4 }
 0x3f9   :  { %1730 = vmatpush2.bf16.msra.mxu1 %v2808_v54 }
 0x3fc   :  { %1732 = vmatmul.mubr.bf16.vlgmr.msra.gmra.mxu1 %v1689_v2 }
 0x4bc   :  { %v1733_v47 = vpop.f32.mrf.mxu1 }
 0x4bd   :  { %v1734_v44 = vadd.f32 %v1733_v47, %v1673_v40 }
 0x4be   :  { %v1735_v41 = vpop.f32.mrf.mxu1 }
 0x4bf   :  { %v1845_v56 = vmul.f32 -1.442695, %v1734_v44  ;;  %v1736_v29 = vadd.f32 %v1735_v41, %v1673_v40 }
 0x4c0   :  { %v1737_v21 = vpop.f32.mrf.mxu1 }
 0x4c1   :  { %1923 = vpow2.f32 %v1845_v56  ;;  %v1846_v19 = vmul.f32 -1.442695, %v1736_v29 }
 0x4c2   :  { %v1738_v60 = vpop.f32.mrf.mxu1 }
 0x4c3   :  { %1925 = vpow2.f32 %v1846_v19 }
 0x4ce   :  { %v1924_v4 = vpop.eup %1923 }
 0x4cf   :  { %v1746_v52 = vadd.f32 1.0, %v1924_v4 }
 0x4d0   :  { %v1926_v58 = vpop.eup %1925 }
 0x4d1   :  { %v1747_v16 = vadd.f32 1.0, %v1926_v58  ;;  %1927 = vrcp.f32 %v1746_v52 }
 0x4d3   :  { %1929 = vrcp.f32 %v1747_v16 }
 0x4de   :  { %v1928_v54 = vpop.eup %1927 }
 0x4e0   :  { %v1930_v1 = vpop.eup %1929 }
 0x4e1   :  { %v1754_v53 = vcombine.low %v1928_v54, %v1930_v1 }
 0x4e3   :  { %v1761_v14 = vrot.slane %v1754_v53, %v2952_v17 }
 0x4e5   :  { %v1768_v45 = vrot.slane %v1761_v14, %v2952_v17 }
 0x4e7   :  { %1774 = vst.msk [vmem:[%s2909_s9] sm:$0x3] %vm1772_vm2, %v1768_v45 }

</bundles_post_ra>
